<compile_context>
chip_gen: v5e
topology: v5e:2x2
jax: 0.10.0
libtpu: 0.0.40
codegen_flags: <defaults>
</compile_context>

<pallas_src>
import math
from functools import partial

import jax
import jax.numpy as jnp
from jax.experimental import pallas as pl
from jax.experimental.pallas import tpu as pltpu


# ---------------------------------------------------------------------------
# GloVe weighting function (host-side Python, used only to build inputs)
# ---------------------------------------------------------------------------
def weighting(w_i, w_j, X_ik):
    try:
        x_ij = X_ik[w_i, w_j]
    except Exception:
        x_ij = 1
    x_max = 100
    alpha = 0.75
    if x_ij < x_max:
        result = (x_ij / x_max) ** alpha
    else:
        result = 1
    return result


# ---------------------------------------------------------------------------
# Pallas kernel: tiled, gather-fused GloVe loss
# ---------------------------------------------------------------------------
def _glove_loss_kernel(tile_b,
                       cw_ref, tw_ref,        # scalar prefetch (SMEM): word ids
                       side_ref,              # (TILE_B, 4) VMEM: [cb, tb, cooc, wt]
                       ce_hbm, te_hbm,        # (V, E) embedding tables in HBM
                       out_ref,               # (1, 1) loss accumulator (resident)
                       ce_buf, te_buf, sems): # VMEM scratch + DMA semaphores
    step = pl.program_id(0)
    base = step * tile_b

    @pl.when(step == 0)
    def _():
        out_ref[...] = jnp.zeros_like(out_ref)

    # Fused row gather: DMA the TILE_B needed rows of each table HBM -> VMEM.
    # (tile_b is a static Python int, so this loop fully unrolls.)
    copies = []
    for r in range(tile_b):
        c_idx = cw_ref[base + r]
        t_idx = tw_ref[base + r]
        c_cp = pltpu.make_async_copy(ce_hbm.at[pl.ds(c_idx, 1)],
                                     ce_buf.at[pl.ds(r, 1)],
                                     sems.at[0, r])
        t_cp = pltpu.make_async_copy(te_hbm.at[pl.ds(t_idx, 1)],
                                     te_buf.at[pl.ds(r, 1)],
                                     sems.at[1, r])
        c_cp.start()
        t_cp.start()
        copies.append((c_cp, t_cp))
    for c_cp, t_cp in copies:
        c_cp.wait()
        t_cp.wait()

    ce = ce_buf[...]                                   # (TILE_B, E) center embeds
    te = te_buf[...]                                   # (TILE_B, E) target embeds
    side = side_ref[...]                               # (TILE_B, 4)
    center_bias = side[:, 0:1]
    target_bias = side[:, 1:2]
    coocs = side[:, 2:3]
    wts = side[:, 3:4]

    # target_embeds.bmm(center_embeds.transpose(1,2)).squeeze(2) == row-wise dot
    inner = jnp.sum(te * ce, axis=-1, keepdims=True)   # (TILE_B, 1)
    diff = inner + center_bias + target_bias - coocs
    tile_loss = jnp.sum(wts * diff * diff, keepdims=True)  # (1, 1)
    out_ref[...] += tile_loss


# ---------------------------------------------------------------------------
# Wrapper: packing / padding glue + pallas_call
# ---------------------------------------------------------------------------
def glove_forward(params, center_words, target_words, coocs, weights, *, tile_b=8):
    assert tile_b % 8 == 0, "tile_b must be a multiple of 8 (sublane tile)"

    cw = center_words.reshape(-1).astype(jnp.int32)    # (B,)
    tw = target_words.reshape(-1).astype(jnp.int32)    # (B,)
    B = cw.shape[0]

    ce_table = params["embedding_center"]
    te_table = params["embedding_outside"]
    if ce_table.dtype != jnp.float32:
        ce_table = ce_table.astype(jnp.float32)
    if te_table.dtype != jnp.float32:
        te_table = te_table.astype(jnp.float32)
    V, E = ce_table.shape

    # The tiny 1-float/row bias gathers stay in XLA; the big E-float/row
    # embedding gathers are fused into the kernel. Pack the four lane-sparse
    # (B,1) columns into one lane-packed (B,4) input.
    cb = params["v_bias"][cw].reshape(B, 1)
    tb = params["u_bias"][tw].reshape(B, 1)
    side = jnp.concatenate(
        [cb, tb, coocs.reshape(B, 1), weights.reshape(B, 1)], axis=1
    ).astype(jnp.float32)                               # (B, 4)

    # Pad the batch to a multiple of tile_b. Padding rows use index 0 and
    # weight 0, so they contribute exactly 0 to the accumulated loss.
    n_tiles = pl.cdiv(B, tile_b)
    b_pad = n_tiles * tile_b
    if b_pad != B:
        pad = b_pad - B
        cw = jnp.concatenate([cw, jnp.zeros((pad,), jnp.int32)])
        tw = jnp.concatenate([tw, jnp.zeros((pad,), jnp.int32)])
        side = jnp.concatenate([side, jnp.zeros((pad, 4), jnp.float32)], axis=0)

    grid_spec = pltpu.PrefetchScalarGridSpec(
        num_scalar_prefetch=2,                          # cw, tw -> SMEM
        grid=(n_tiles,),
        in_specs=[
            pl.BlockSpec((tile_b, 4), lambda i, cw_r, tw_r: (i, 0)),  # packed side
            pl.BlockSpec(memory_space=pl.ANY),          # embedding_center (HBM)
            pl.BlockSpec(memory_space=pl.ANY),          # embedding_outside (HBM)
        ],
        out_specs=pl.BlockSpec((1, 1), lambda i, cw_r, tw_r: (0, 0)),
        scratch_shapes=[
            pltpu.VMEM((tile_b, E), jnp.float32),       # gathered center rows
            pltpu.VMEM((tile_b, E), jnp.float32),       # gathered target rows
            pltpu.SemaphoreType.DMA((2, tile_b)),
        ],
    )

    cost = pl.CostEstimate(
        flops=int(b_pad * (2 * E + 6)),
        transcendentals=0,
        bytes_accessed=int(b_pad * (2 * E + 4) * 4 + 2 * b_pad * 4 + 4),
    )

    out = pl.pallas_call(
        partial(_glove_loss_kernel, tile_b),
        grid_spec=grid_spec,
        out_shape=jax.ShapeDtypeStruct((1, 1), jnp.float32),
        compiler_params=pltpu.CompilerParams(
            dimension_semantics=("arbitrary",),         # loss is accumulated
        ),
        cost_estimate=cost,
    )(cw, tw, side, ce_table, te_table)
    return out[0, 0]


if __name__ == "__main__":
    vocab_size = 16
    embed_size = 128   # lane-dense: keep E a multiple of 128
    batch = 12         # deliberately not a multiple of tile_b -> exercises tail padding

    key = jax.random.PRNGKey(0)
    k1, k2, k3, k4, k5, k6 = jax.random.split(key, 6)

    # nn.Embedding default init: N(0, 1)
    params = {
        "embedding_center": jax.random.normal(k1, (vocab_size, embed_size), jnp.float32),
        "embedding_outside": jax.random.normal(k2, (vocab_size, embed_size), jnp.float32),
        "v_bias": jax.random.normal(k3, (vocab_size, 1), jnp.float32),
        "u_bias": jax.random.normal(k4, (vocab_size, 1), jnp.float32),
    }

    center_words = jax.random.randint(k5, (batch, 1), 0, vocab_size, jnp.int32)
    target_words = jax.random.randint(k6, (batch, 1), 0, vocab_size, jnp.int32)

    # Deterministic synthetic co-occurrence counts and derived coocs / weights.
    X_ik = {}
    cw_host = jax.device_get(center_words).reshape(-1).tolist()
    tw_host = jax.device_get(target_words).reshape(-1).tolist()
    for i, (wi, wj) in enumerate(zip(cw_host, tw_host)):
        X_ik[(wi, wj)] = (i % 5) + 1
    coocs = jnp.array(
        [[math.log(X_ik[(wi, wj)])] for wi, wj in zip(cw_host, tw_host)],
        dtype=jnp.float32,
    )
    weights = jnp.array(
        [[weighting(wi, wj, X_ik)] for wi, wj in zip(cw_host, tw_host)],
        dtype=jnp.float32,
    )

    loss = glove_forward(params, center_words, target_words, coocs, weights, tile_b=8)
    jax.block_until_ready(loss)

    # Reference check in plain JAX (matches the PyTorch forward).
    ce = params["embedding_center"][center_words.reshape(-1)]
    te = params["embedding_outside"][target_words.reshape(-1)]
    cb = params["v_bias"][center_words.reshape(-1)]
    tb = params["u_bias"][target_words.reshape(-1)]
    inner = jnp.sum(te * ce, axis=-1, keepdims=True)
    ref = jnp.sum(weights * (inner + cb + tb - coocs) ** 2)
    assert jnp.allclose(loss, ref, rtol=1e-5, atol=1e-5), (loss, ref)

    print("KERNEL_OK")
</pallas_src>

<mosaic_0001>
module attributes {stable_mosaic.version = 11 : i64} {
  func.func @_glove_loss_kernel(%arg0: i32, %arg1: memref<16xi32, #tpu.memory_space<smem>>, %arg2: memref<16xi32, #tpu.memory_space<smem>>, %arg3: memref<8x4xf32, #tpu.memory_space<vmem>>, %arg4: memref<16x128xf32, #tpu.memory_space<any>>, %arg5: memref<16x128xf32, #tpu.memory_space<any>>, %arg6: memref<1x1xf32, #tpu.memory_space<vmem>>, %arg7: memref<8x128xf32, #tpu.memory_space<vmem>>, %arg8: memref<8x128xf32, #tpu.memory_space<vmem>>, %arg9: memref<2x8x!tpu.dma_semaphore, #tpu.memory_space<semaphore_mem>>) attributes {dimension_semantics = [#tpu.dimension_semantics<arbitrary>], iteration_bounds = array<i64: 2>, scalar_prefetch = 2 : i64, scratch_operands = 3 : i64, tpu.core_type = #tpu.core_type<tc>, window_params = [{transform_indices = @transform_0, window_bounds = array<i64: 8, 4>}, {}, {}, {pipeline_mode = #tpu.pipeline_mode<synchronous>, transform_indices = @transform_3, window_bounds = array<i64: 1, 1>}]} {
    %c8_i32 = arith.constant 8 : i32
    %0 = arith.muli %arg0, %c8_i32 : i32
    %c0_i32 = arith.constant 0 : i32
    %1 = arith.cmpi eq, %arg0, %c0_i32 : i32
    %2 = arith.extui %1 : i1 to i32
    %c0_i32_0 = arith.constant 0 : i32
    %3 = arith.cmpi ne, %2, %c0_i32_0 : i32
    scf.if %3 {
      %cst_180 = arith.constant 0.000000e+00 : f32
      %203 = vector.broadcast %cst_180 : f32 to vector<1x1xf32>
      %c0_181 = arith.constant 0 : index
      %c0_182 = arith.constant 0 : index
      %204 = vector.load %arg6[%c0_181, %c0_182] : memref<1x1xf32, #tpu.memory_space<vmem>>, vector<1x1xf32>
      tpu.vector_store %arg6[%c0_181, %c0_182], %203 {strides = array<i32>} : memref<1x1xf32, #tpu.memory_space<vmem>>, vector<1x1xf32>,
    } else {
    }
    %c0_i32_1 = arith.constant 0 : i32
    %4 = arith.addi %0, %c0_i32_1 : i32
    %5 = arith.index_cast %4 : i32 to index
    %6 = memref.load %arg1[%5] : memref<16xi32, #tpu.memory_space<smem>>
    %c0_i32_2 = arith.constant 0 : i32
    %7 = arith.addi %0, %c0_i32_2 : i32
    %8 = arith.index_cast %7 : i32 to index
    %9 = memref.load %arg2[%8] : memref<16xi32, #tpu.memory_space<smem>>
    %c0_i32_3 = arith.constant 0 : i32
    %c0_i32_4 = arith.constant 0 : i32
    %c0_i32_5 = arith.constant 0 : i32
    %10 = tpu.memref_slice %arg4[%6, %c0_i32_5] : memref<16x128xf32, #tpu.memory_space<any>> -> memref<1x128xf32, #tpu.memory_space<any>>
    %c0_i32_6 = arith.constant 0 : i32
    %c0_i32_7 = arith.constant 0 : i32
    %11 = tpu.memref_slice %arg7[%c0_i32_6, %c0_i32_7] : memref<8x128xf32, #tpu.memory_space<vmem>> -> memref<1x128xf32, #tpu.memory_space<vmem>>
    %12 = tpu.memref_slice %arg9[%c0_i32_3, %c0_i32_4] : memref<2x8x!tpu.dma_semaphore, #tpu.memory_space<semaphore_mem>> -> memref<1x1x!tpu.dma_semaphore, #tpu.memory_space<semaphore_mem>>
    %13 = tpu.memref_squeeze %12 : memref<1x1x!tpu.dma_semaphore, #tpu.memory_space<semaphore_mem>> -> memref<!tpu.dma_semaphore, #tpu.memory_space<semaphore_mem>>
    tpu.enqueue_dma source(%10 : memref<1x128xf32, #tpu.memory_space<any>>) target(%11 : memref<1x128xf32, #tpu.memory_space<vmem>>) target_semaphore(%13 : memref<!tpu.dma_semaphore, #tpu.memory_space<semaphore_mem>>)
    %c1_i32 = arith.constant 1 : i32
    %c0_i32_8 = arith.constant 0 : i32
    %c0_i32_9 = arith.constant 0 : i32
    %14 = tpu.memref_slice %arg5[%9, %c0_i32_9] : memref<16x128xf32, #tpu.memory_space<any>> -> memref<1x128xf32, #tpu.memory_space<any>>
    %c0_i32_10 = arith.constant 0 : i32
    %c0_i32_11 = arith.constant 0 : i32
    %15 = tpu.memref_slice %arg8[%c0_i32_10, %c0_i32_11] : memref<8x128xf32, #tpu.memory_space<vmem>> -> memref<1x128xf32, #tpu.memory_space<vmem>>
    %16 = tpu.memref_slice %arg9[%c1_i32, %c0_i32_8] : memref<2x8x!tpu.dma_semaphore, #tpu.memory_space<semaphore_mem>> -> memref<1x1x!tpu.dma_semaphore, #tpu.memory_space<semaphore_mem>>
    %17 = tpu.memref_squeeze %16 : memref<1x1x!tpu.dma_semaphore, #tpu.memory_space<semaphore_mem>> -> memref<!tpu.dma_semaphore, #tpu.memory_space<semaphore_mem>>
    tpu.enqueue_dma source(%14 : memref<1x128xf32, #tpu.memory_space<any>>) target(%15 : memref<1x128xf32, #tpu.memory_space<vmem>>) target_semaphore(%17 : memref<!tpu.dma_semaphore, #tpu.memory_space<semaphore_mem>>)
    %c1_i32_12 = arith.constant 1 : i32
    %18 = arith.addi %0, %c1_i32_12 : i32
    %19 = arith.index_cast %18 : i32 to index
    %20 = memref.load %arg1[%19] : memref<16xi32, #tpu.memory_space<smem>>
    %c1_i32_13 = arith.constant 1 : i32
    %21 = arith.addi %0, %c1_i32_13 : i32
    %22 = arith.index_cast %21 : i32 to index
    %23 = memref.load %arg2[%22] : memref<16xi32, #tpu.memory_space<smem>>
    %c0_i32_14 = arith.constant 0 : i32
    %c1_i32_15 = arith.constant 1 : i32
    %c0_i32_16 = arith.constant 0 : i32
    %24 = tpu.memref_slice %arg4[%20, %c0_i32_16] : memref<16x128xf32, #tpu.memory_space<any>> -> memref<1x128xf32, #tpu.memory_space<any>>
    %c1_i32_17 = arith.constant 1 : i32
    %c0_i32_18 = arith.constant 0 : i32
    %25 = tpu.memref_slice %arg7[%c1_i32_17, %c0_i32_18] : memref<8x128xf32, #tpu.memory_space<vmem>> -> memref<1x128xf32, #tpu.memory_space<vmem>>
    %26 = tpu.memref_slice %arg9[%c0_i32_14, %c1_i32_15] : memref<2x8x!tpu.dma_semaphore, #tpu.memory_space<semaphore_mem>> -> memref<1x1x!tpu.dma_semaphore, #tpu.memory_space<semaphore_mem>>
    %27 = tpu.memref_squeeze %26 : memref<1x1x!tpu.dma_semaphore, #tpu.memory_space<semaphore_mem>> -> memref<!tpu.dma_semaphore, #tpu.memory_space<semaphore_mem>>
    tpu.enqueue_dma source(%24 : memref<1x128xf32, #tpu.memory_space<any>>) target(%25 : memref<1x128xf32, #tpu.memory_space<vmem>>) target_semaphore(%27 : memref<!tpu.dma_semaphore, #tpu.memory_space<semaphore_mem>>)
    %c1_i32_19 = arith.constant 1 : i32
    %c1_i32_20 = arith.constant 1 : i32
    %c0_i32_21 = arith.constant 0 : i32
    %28 = tpu.memref_slice %arg5[%23, %c0_i32_21] : memref<16x128xf32, #tpu.memory_space<any>> -> memref<1x128xf32, #tpu.memory_space<any>>
    %c1_i32_22 = arith.constant 1 : i32
    %c0_i32_23 = arith.constant 0 : i32
    %29 = tpu.memref_slice %arg8[%c1_i32_22, %c0_i32_23] : memref<8x128xf32, #tpu.memory_space<vmem>> -> memref<1x128xf32, #tpu.memory_space<vmem>>
    %30 = tpu.memref_slice %arg9[%c1_i32_19, %c1_i32_20] : memref<2x8x!tpu.dma_semaphore, #tpu.memory_space<semaphore_mem>> -> memref<1x1x!tpu.dma_semaphore, #tpu.memory_space<semaphore_mem>>
    %31 = tpu.memref_squeeze %30 : memref<1x1x!tpu.dma_semaphore, #tpu.memory_space<semaphore_mem>> -> memref<!tpu.dma_semaphore, #tpu.memory_space<semaphore_mem>>
    tpu.enqueue_dma source(%28 : memref<1x128xf32, #tpu.memory_space<any>>) target(%29 : memref<1x128xf32, #tpu.memory_space<vmem>>) target_semaphore(%31 : memref<!tpu.dma_semaphore, #tpu.memory_space<semaphore_mem>>)
    %c2_i32 = arith.constant 2 : i32
    %32 = arith.addi %0, %c2_i32 : i32
    %33 = arith.index_cast %32 : i32 to index
    %34 = memref.load %arg1[%33] : memref<16xi32, #tpu.memory_space<smem>>
    %c2_i32_24 = arith.constant 2 : i32
    %35 = arith.addi %0, %c2_i32_24 : i32
    %36 = arith.index_cast %35 : i32 to index
    %37 = memref.load %arg2[%36] : memref<16xi32, #tpu.memory_space<smem>>
    %c0_i32_25 = arith.constant 0 : i32
    %c2_i32_26 = arith.constant 2 : i32
    %c0_i32_27 = arith.constant 0 : i32
    %38 = tpu.memref_slice %arg4[%34, %c0_i32_27] : memref<16x128xf32, #tpu.memory_space<any>> -> memref<1x128xf32, #tpu.memory_space<any>>
    %c2_i32_28 = arith.constant 2 : i32
    %c0_i32_29 = arith.constant 0 : i32
    %39 = tpu.memref_slice %arg7[%c2_i32_28, %c0_i32_29] : memref<8x128xf32, #tpu.memory_space<vmem>> -> memref<1x128xf32, #tpu.memory_space<vmem>>
    %40 = tpu.memref_slice %arg9[%c0_i32_25, %c2_i32_26] : memref<2x8x!tpu.dma_semaphore, #tpu.memory_space<semaphore_mem>> -> memref<1x1x!tpu.dma_semaphore, #tpu.memory_space<semaphore_mem>>
    %41 = tpu.memref_squeeze %40 : memref<1x1x!tpu.dma_semaphore, #tpu.memory_space<semaphore_mem>> -> memref<!tpu.dma_semaphore, #tpu.memory_space<semaphore_mem>>
    tpu.enqueue_dma source(%38 : memref<1x128xf32, #tpu.memory_space<any>>) target(%39 : memref<1x128xf32, #tpu.memory_space<vmem>>) target_semaphore(%41 : memref<!tpu.dma_semaphore, #tpu.memory_space<semaphore_mem>>)
    %c1_i32_30 = arith.constant 1 : i32
    %c2_i32_31 = arith.constant 2 : i32
    %c0_i32_32 = arith.constant 0 : i32
    %42 = tpu.memref_slice %arg5[%37, %c0_i32_32] : memref<16x128xf32, #tpu.memory_space<any>> -> memref<1x128xf32, #tpu.memory_space<any>>
    %c2_i32_33 = arith.constant 2 : i32
    %c0_i32_34 = arith.constant 0 : i32
    %43 = tpu.memref_slice %arg8[%c2_i32_33, %c0_i32_34] : memref<8x128xf32, #tpu.memory_space<vmem>> -> memref<1x128xf32, #tpu.memory_space<vmem>>
    %44 = tpu.memref_slice %arg9[%c1_i32_30, %c2_i32_31] : memref<2x8x!tpu.dma_semaphore, #tpu.memory_space<semaphore_mem>> -> memref<1x1x!tpu.dma_semaphore, #tpu.memory_space<semaphore_mem>>
    %45 = tpu.memref_squeeze %44 : memref<1x1x!tpu.dma_semaphore, #tpu.memory_space<semaphore_mem>> -> memref<!tpu.dma_semaphore, #tpu.memory_space<semaphore_mem>>
    tpu.enqueue_dma source(%42 : memref<1x128xf32, #tpu.memory_space<any>>) target(%43 : memref<1x128xf32, #tpu.memory_space<vmem>>) target_semaphore(%45 : memref<!tpu.dma_semaphore, #tpu.memory_space<semaphore_mem>>)
    %c3_i32 = arith.constant 3 : i32
    %46 = arith.addi %0, %c3_i32 : i32
    %47 = arith.index_cast %46 : i32 to index
    %48 = memref.load %arg1[%47] : memref<16xi32, #tpu.memory_space<smem>>
    %c3_i32_35 = arith.constant 3 : i32
    %49 = arith.addi %0, %c3_i32_35 : i32
    %50 = arith.index_cast %49 : i32 to index
    %51 = memref.load %arg2[%50] : memref<16xi32, #tpu.memory_space<smem>>
    %c0_i32_36 = arith.constant 0 : i32
    %c3_i32_37 = arith.constant 3 : i32
    %c0_i32_38 = arith.constant 0 : i32
    %52 = tpu.memref_slice %arg4[%48, %c0_i32_38] : memref<16x128xf32, #tpu.memory_space<any>> -> memref<1x128xf32, #tpu.memory_space<any>>
    %c3_i32_39 = arith.constant 3 : i32
    %c0_i32_40 = arith.constant 0 : i32
    %53 = tpu.memref_slice %arg7[%c3_i32_39, %c0_i32_40] : memref<8x128xf32, #tpu.memory_space<vmem>> -> memref<1x128xf32, #tpu.memory_space<vmem>>
    %54 = tpu.memref_slice %arg9[%c0_i32_36, %c3_i32_37] : memref<2x8x!tpu.dma_semaphore, #tpu.memory_space<semaphore_mem>> -> memref<1x1x!tpu.dma_semaphore, #tpu.memory_space<semaphore_mem>>
    %55 = tpu.memref_squeeze %54 : memref<1x1x!tpu.dma_semaphore, #tpu.memory_space<semaphore_mem>> -> memref<!tpu.dma_semaphore, #tpu.memory_space<semaphore_mem>>
    tpu.enqueue_dma source(%52 : memref<1x128xf32, #tpu.memory_space<any>>) target(%53 : memref<1x128xf32, #tpu.memory_space<vmem>>) target_semaphore(%55 : memref<!tpu.dma_semaphore, #tpu.memory_space<semaphore_mem>>)
    %c1_i32_41 = arith.constant 1 : i32
    %c3_i32_42 = arith.constant 3 : i32
    %c0_i32_43 = arith.constant 0 : i32
    %56 = tpu.memref_slice %arg5[%51, %c0_i32_43] : memref<16x128xf32, #tpu.memory_space<any>> -> memref<1x128xf32, #tpu.memory_space<any>>
    %c3_i32_44 = arith.constant 3 : i32
    %c0_i32_45 = arith.constant 0 : i32
    %57 = tpu.memref_slice %arg8[%c3_i32_44, %c0_i32_45] : memref<8x128xf32, #tpu.memory_space<vmem>> -> memref<1x128xf32, #tpu.memory_space<vmem>>
    %58 = tpu.memref_slice %arg9[%c1_i32_41, %c3_i32_42] : memref<2x8x!tpu.dma_semaphore, #tpu.memory_space<semaphore_mem>> -> memref<1x1x!tpu.dma_semaphore, #tpu.memory_space<semaphore_mem>>
    %59 = tpu.memref_squeeze %58 : memref<1x1x!tpu.dma_semaphore, #tpu.memory_space<semaphore_mem>> -> memref<!tpu.dma_semaphore, #tpu.memory_space<semaphore_mem>>
    tpu.enqueue_dma source(%56 : memref<1x128xf32, #tpu.memory_space<any>>) target(%57 : memref<1x128xf32, #tpu.memory_space<vmem>>) target_semaphore(%59 : memref<!tpu.dma_semaphore, #tpu.memory_space<semaphore_mem>>)
    %c4_i32 = arith.constant 4 : i32
    %60 = arith.addi %0, %c4_i32 : i32
    %61 = arith.index_cast %60 : i32 to index
    %62 = memref.load %arg1[%61] : memref<16xi32, #tpu.memory_space<smem>>
    %c4_i32_46 = arith.constant 4 : i32
    %63 = arith.addi %0, %c4_i32_46 : i32
    %64 = arith.index_cast %63 : i32 to index
    %65 = memref.load %arg2[%64] : memref<16xi32, #tpu.memory_space<smem>>
    %c0_i32_47 = arith.constant 0 : i32
    %c4_i32_48 = arith.constant 4 : i32
    %c0_i32_49 = arith.constant 0 : i32
    %66 = tpu.memref_slice %arg4[%62, %c0_i32_49] : memref<16x128xf32, #tpu.memory_space<any>> -> memref<1x128xf32, #tpu.memory_space<any>>
    %c4_i32_50 = arith.constant 4 : i32
    %c0_i32_51 = arith.constant 0 : i32
    %67 = tpu.memref_slice %arg7[%c4_i32_50, %c0_i32_51] : memref<8x128xf32, #tpu.memory_space<vmem>> -> memref<1x128xf32, #tpu.memory_space<vmem>>
    %68 = tpu.memref_slice %arg9[%c0_i32_47, %c4_i32_48] : memref<2x8x!tpu.dma_semaphore, #tpu.memory_space<semaphore_mem>> -> memref<1x1x!tpu.dma_semaphore, #tpu.memory_space<semaphore_mem>>
    %69 = tpu.memref_squeeze %68 : memref<1x1x!tpu.dma_semaphore, #tpu.memory_space<semaphore_mem>> -> memref<!tpu.dma_semaphore, #tpu.memory_space<semaphore_mem>>
    tpu.enqueue_dma source(%66 : memref<1x128xf32, #tpu.memory_space<any>>) target(%67 : memref<1x128xf32, #tpu.memory_space<vmem>>) target_semaphore(%69 : memref<!tpu.dma_semaphore, #tpu.memory_space<semaphore_mem>>)
    %c1_i32_52 = arith.constant 1 : i32
    %c4_i32_53 = arith.constant 4 : i32
    %c0_i32_54 = arith.constant 0 : i32
    %70 = tpu.memref_slice %arg5[%65, %c0_i32_54] : memref<16x128xf32, #tpu.memory_space<any>> -> memref<1x128xf32, #tpu.memory_space<any>>
    %c4_i32_55 = arith.constant 4 : i32
    %c0_i32_56 = arith.constant 0 : i32
    %71 = tpu.memref_slice %arg8[%c4_i32_55, %c0_i32_56] : memref<8x128xf32, #tpu.memory_space<vmem>> -> memref<1x128xf32, #tpu.memory_space<vmem>>
    %72 = tpu.memref_slice %arg9[%c1_i32_52, %c4_i32_53] : memref<2x8x!tpu.dma_semaphore, #tpu.memory_space<semaphore_mem>> -> memref<1x1x!tpu.dma_semaphore, #tpu.memory_space<semaphore_mem>>
    %73 = tpu.memref_squeeze %72 : memref<1x1x!tpu.dma_semaphore, #tpu.memory_space<semaphore_mem>> -> memref<!tpu.dma_semaphore, #tpu.memory_space<semaphore_mem>>
    tpu.enqueue_dma source(%70 : memref<1x128xf32, #tpu.memory_space<any>>) target(%71 : memref<1x128xf32, #tpu.memory_space<vmem>>) target_semaphore(%73 : memref<!tpu.dma_semaphore, #tpu.memory_space<semaphore_mem>>)
    %c5_i32 = arith.constant 5 : i32
    %74 = arith.addi %0, %c5_i32 : i32
    %75 = arith.index_cast %74 : i32 to index
    %76 = memref.load %arg1[%75] : memref<16xi32, #tpu.memory_space<smem>>
    %c5_i32_57 = arith.constant 5 : i32
    %77 = arith.addi %0, %c5_i32_57 : i32
    %78 = arith.index_cast %77 : i32 to index
    %79 = memref.load %arg2[%78] : memref<16xi32, #tpu.memory_space<smem>>
    %c0_i32_58 = arith.constant 0 : i32
    %c5_i32_59 = arith.constant 5 : i32
    %c0_i32_60 = arith.constant 0 : i32
    %80 = tpu.memref_slice %arg4[%76, %c0_i32_60] : memref<16x128xf32, #tpu.memory_space<any>> -> memref<1x128xf32, #tpu.memory_space<any>>
    %c5_i32_61 = arith.constant 5 : i32
    %c0_i32_62 = arith.constant 0 : i32
    %81 = tpu.memref_slice %arg7[%c5_i32_61, %c0_i32_62] : memref<8x128xf32, #tpu.memory_space<vmem>> -> memref<1x128xf32, #tpu.memory_space<vmem>>
    %82 = tpu.memref_slice %arg9[%c0_i32_58, %c5_i32_59] : memref<2x8x!tpu.dma_semaphore, #tpu.memory_space<semaphore_mem>> -> memref<1x1x!tpu.dma_semaphore, #tpu.memory_space<semaphore_mem>>
    %83 = tpu.memref_squeeze %82 : memref<1x1x!tpu.dma_semaphore, #tpu.memory_space<semaphore_mem>> -> memref<!tpu.dma_semaphore, #tpu.memory_space<semaphore_mem>>
    tpu.enqueue_dma source(%80 : memref<1x128xf32, #tpu.memory_space<any>>) target(%81 : memref<1x128xf32, #tpu.memory_space<vmem>>) target_semaphore(%83 : memref<!tpu.dma_semaphore, #tpu.memory_space<semaphore_mem>>)
    %c1_i32_63 = arith.constant 1 : i32
    %c5_i32_64 = arith.constant 5 : i32
    %c0_i32_65 = arith.constant 0 : i32
    %84 = tpu.memref_slice %arg5[%79, %c0_i32_65] : memref<16x128xf32, #tpu.memory_space<any>> -> memref<1x128xf32, #tpu.memory_space<any>>
    %c5_i32_66 = arith.constant 5 : i32
    %c0_i32_67 = arith.constant 0 : i32
    %85 = tpu.memref_slice %arg8[%c5_i32_66, %c0_i32_67] : memref<8x128xf32, #tpu.memory_space<vmem>> -> memref<1x128xf32, #tpu.memory_space<vmem>>
    %86 = tpu.memref_slice %arg9[%c1_i32_63, %c5_i32_64] : memref<2x8x!tpu.dma_semaphore, #tpu.memory_space<semaphore_mem>> -> memref<1x1x!tpu.dma_semaphore, #tpu.memory_space<semaphore_mem>>
    %87 = tpu.memref_squeeze %86 : memref<1x1x!tpu.dma_semaphore, #tpu.memory_space<semaphore_mem>> -> memref<!tpu.dma_semaphore, #tpu.memory_space<semaphore_mem>>
    tpu.enqueue_dma source(%84 : memref<1x128xf32, #tpu.memory_space<any>>) target(%85 : memref<1x128xf32, #tpu.memory_space<vmem>>) target_semaphore(%87 : memref<!tpu.dma_semaphore, #tpu.memory_space<semaphore_mem>>)
    %c6_i32 = arith.constant 6 : i32
    %88 = arith.addi %0, %c6_i32 : i32
    %89 = arith.index_cast %88 : i32 to index
    %90 = memref.load %arg1[%89] : memref<16xi32, #tpu.memory_space<smem>>
    %c6_i32_68 = arith.constant 6 : i32
    %91 = arith.addi %0, %c6_i32_68 : i32
    %92 = arith.index_cast %91 : i32 to index
    %93 = memref.load %arg2[%92] : memref<16xi32, #tpu.memory_space<smem>>
    %c0_i32_69 = arith.constant 0 : i32
    %c6_i32_70 = arith.constant 6 : i32
    %c0_i32_71 = arith.constant 0 : i32
    %94 = tpu.memref_slice %arg4[%90, %c0_i32_71] : memref<16x128xf32, #tpu.memory_space<any>> -> memref<1x128xf32, #tpu.memory_space<any>>
    %c6_i32_72 = arith.constant 6 : i32
    %c0_i32_73 = arith.constant 0 : i32
    %95 = tpu.memref_slice %arg7[%c6_i32_72, %c0_i32_73] : memref<8x128xf32, #tpu.memory_space<vmem>> -> memref<1x128xf32, #tpu.memory_space<vmem>>
    %96 = tpu.memref_slice %arg9[%c0_i32_69, %c6_i32_70] : memref<2x8x!tpu.dma_semaphore, #tpu.memory_space<semaphore_mem>> -> memref<1x1x!tpu.dma_semaphore, #tpu.memory_space<semaphore_mem>>
    %97 = tpu.memref_squeeze %96 : memref<1x1x!tpu.dma_semaphore, #tpu.memory_space<semaphore_mem>> -> memref<!tpu.dma_semaphore, #tpu.memory_space<semaphore_mem>>
    tpu.enqueue_dma source(%94 : memref<1x128xf32, #tpu.memory_space<any>>) target(%95 : memref<1x128xf32, #tpu.memory_space<vmem>>) target_semaphore(%97 : memref<!tpu.dma_semaphore, #tpu.memory_space<semaphore_mem>>)
    %c1_i32_74 = arith.constant 1 : i32
    %c6_i32_75 = arith.constant 6 : i32
    %c0_i32_76 = arith.constant 0 : i32
    %98 = tpu.memref_slice %arg5[%93, %c0_i32_76] : memref<16x128xf32, #tpu.memory_space<any>> -> memref<1x128xf32, #tpu.memory_space<any>>
    %c6_i32_77 = arith.constant 6 : i32
    %c0_i32_78 = arith.constant 0 : i32
    %99 = tpu.memref_slice %arg8[%c6_i32_77, %c0_i32_78] : memref<8x128xf32, #tpu.memory_space<vmem>> -> memref<1x128xf32, #tpu.memory_space<vmem>>
    %100 = tpu.memref_slice %arg9[%c1_i32_74, %c6_i32_75] : memref<2x8x!tpu.dma_semaphore, #tpu.memory_space<semaphore_mem>> -> memref<1x1x!tpu.dma_semaphore, #tpu.memory_space<semaphore_mem>>
    %101 = tpu.memref_squeeze %100 : memref<1x1x!tpu.dma_semaphore, #tpu.memory_space<semaphore_mem>> -> memref<!tpu.dma_semaphore, #tpu.memory_space<semaphore_mem>>
    tpu.enqueue_dma source(%98 : memref<1x128xf32, #tpu.memory_space<any>>) target(%99 : memref<1x128xf32, #tpu.memory_space<vmem>>) target_semaphore(%101 : memref<!tpu.dma_semaphore, #tpu.memory_space<semaphore_mem>>)
    %c7_i32 = arith.constant 7 : i32
    %102 = arith.addi %0, %c7_i32 : i32
    %103 = arith.index_cast %102 : i32 to index
    %104 = memref.load %arg1[%103] : memref<16xi32, #tpu.memory_space<smem>>
    %c7_i32_79 = arith.constant 7 : i32
    %105 = arith.addi %0, %c7_i32_79 : i32
    %106 = arith.index_cast %105 : i32 to index
    %107 = memref.load %arg2[%106] : memref<16xi32, #tpu.memory_space<smem>>
    %c0_i32_80 = arith.constant 0 : i32
    %c7_i32_81 = arith.constant 7 : i32
    %c0_i32_82 = arith.constant 0 : i32
    %108 = tpu.memref_slice %arg4[%104, %c0_i32_82] : memref<16x128xf32, #tpu.memory_space<any>> -> memref<1x128xf32, #tpu.memory_space<any>>
    %c7_i32_83 = arith.constant 7 : i32
    %c0_i32_84 = arith.constant 0 : i32
    %109 = tpu.memref_slice %arg7[%c7_i32_83, %c0_i32_84] : memref<8x128xf32, #tpu.memory_space<vmem>> -> memref<1x128xf32, #tpu.memory_space<vmem>>
    %110 = tpu.memref_slice %arg9[%c0_i32_80, %c7_i32_81] : memref<2x8x!tpu.dma_semaphore, #tpu.memory_space<semaphore_mem>> -> memref<1x1x!tpu.dma_semaphore, #tpu.memory_space<semaphore_mem>>
    %111 = tpu.memref_squeeze %110 : memref<1x1x!tpu.dma_semaphore, #tpu.memory_space<semaphore_mem>> -> memref<!tpu.dma_semaphore, #tpu.memory_space<semaphore_mem>>
    tpu.enqueue_dma source(%108 : memref<1x128xf32, #tpu.memory_space<any>>) target(%109 : memref<1x128xf32, #tpu.memory_space<vmem>>) target_semaphore(%111 : memref<!tpu.dma_semaphore, #tpu.memory_space<semaphore_mem>>)
    %c1_i32_85 = arith.constant 1 : i32
    %c7_i32_86 = arith.constant 7 : i32
    %c0_i32_87 = arith.constant 0 : i32
    %112 = tpu.memref_slice %arg5[%107, %c0_i32_87] : memref<16x128xf32, #tpu.memory_space<any>> -> memref<1x128xf32, #tpu.memory_space<any>>
    %c7_i32_88 = arith.constant 7 : i32
    %c0_i32_89 = arith.constant 0 : i32
    %113 = tpu.memref_slice %arg8[%c7_i32_88, %c0_i32_89] : memref<8x128xf32, #tpu.memory_space<vmem>> -> memref<1x128xf32, #tpu.memory_space<vmem>>
    %114 = tpu.memref_slice %arg9[%c1_i32_85, %c7_i32_86] : memref<2x8x!tpu.dma_semaphore, #tpu.memory_space<semaphore_mem>> -> memref<1x1x!tpu.dma_semaphore, #tpu.memory_space<semaphore_mem>>
    %115 = tpu.memref_squeeze %114 : memref<1x1x!tpu.dma_semaphore, #tpu.memory_space<semaphore_mem>> -> memref<!tpu.dma_semaphore, #tpu.memory_space<semaphore_mem>>
    tpu.enqueue_dma source(%112 : memref<1x128xf32, #tpu.memory_space<any>>) target(%113 : memref<1x128xf32, #tpu.memory_space<vmem>>) target_semaphore(%115 : memref<!tpu.dma_semaphore, #tpu.memory_space<semaphore_mem>>)
    %c0_i32_90 = arith.constant 0 : i32
    %c0_i32_91 = arith.constant 0 : i32
    %c0_i32_92 = arith.constant 0 : i32
    %116 = tpu.memref_slice %arg4[%6, %c0_i32_92] : memref<16x128xf32, #tpu.memory_space<any>> -> memref<1x128xf32, #tpu.memory_space<any>>
    %c0_i32_93 = arith.constant 0 : i32
    %c0_i32_94 = arith.constant 0 : i32
    %117 = tpu.memref_slice %arg7[%c0_i32_93, %c0_i32_94] : memref<8x128xf32, #tpu.memory_space<vmem>> -> memref<1x128xf32, #tpu.memory_space<vmem>>
    %118 = tpu.memref_slice %arg9[%c0_i32_90, %c0_i32_91] : memref<2x8x!tpu.dma_semaphore, #tpu.memory_space<semaphore_mem>> -> memref<1x1x!tpu.dma_semaphore, #tpu.memory_space<semaphore_mem>>
    %119 = tpu.memref_squeeze %118 : memref<1x1x!tpu.dma_semaphore, #tpu.memory_space<semaphore_mem>> -> memref<!tpu.dma_semaphore, #tpu.memory_space<semaphore_mem>>
    tpu.wait_dma2 semaphore(%119 : memref<!tpu.dma_semaphore, #tpu.memory_space<semaphore_mem>>) src(%116 : memref<1x128xf32, #tpu.memory_space<any>>) dst(%117 : memref<1x128xf32, #tpu.memory_space<vmem>>)
    %c1_i32_95 = arith.constant 1 : i32
    %c0_i32_96 = arith.constant 0 : i32
    %c0_i32_97 = arith.constant 0 : i32
    %120 = tpu.memref_slice %arg5[%9, %c0_i32_97] : memref<16x128xf32, #tpu.memory_space<any>> -> memref<1x128xf32, #tpu.memory_space<any>>
    %c0_i32_98 = arith.constant 0 : i32
    %c0_i32_99 = arith.constant 0 : i32
    %121 = tpu.memref_slice %arg8[%c0_i32_98, %c0_i32_99] : memref<8x128xf32, #tpu.memory_space<vmem>> -> memref<1x128xf32, #tpu.memory_space<vmem>>
    %122 = tpu.memref_slice %arg9[%c1_i32_95, %c0_i32_96] : memref<2x8x!tpu.dma_semaphore, #tpu.memory_space<semaphore_mem>> -> memref<1x1x!tpu.dma_semaphore, #tpu.memory_space<semaphore_mem>>
    %123 = tpu.memref_squeeze %122 : memref<1x1x!tpu.dma_semaphore, #tpu.memory_space<semaphore_mem>> -> memref<!tpu.dma_semaphore, #tpu.memory_space<semaphore_mem>>
    tpu.wait_dma2 semaphore(%123 : memref<!tpu.dma_semaphore, #tpu.memory_space<semaphore_mem>>) src(%120 : memref<1x128xf32, #tpu.memory_space<any>>) dst(%121 : memref<1x128xf32, #tpu.memory_space<vmem>>)
    %c0_i32_100 = arith.constant 0 : i32
    %c1_i32_101 = arith.constant 1 : i32
    %c0_i32_102 = arith.constant 0 : i32
    %124 = tpu.memref_slice %arg4[%20, %c0_i32_102] : memref<16x128xf32, #tpu.memory_space<any>> -> memref<1x128xf32, #tpu.memory_space<any>>
    %c1_i32_103 = arith.constant 1 : i32
    %c0_i32_104 = arith.constant 0 : i32
    %125 = tpu.memref_slice %arg7[%c1_i32_103, %c0_i32_104] : memref<8x128xf32, #tpu.memory_space<vmem>> -> memref<1x128xf32, #tpu.memory_space<vmem>>
    %126 = tpu.memref_slice %arg9[%c0_i32_100, %c1_i32_101] : memref<2x8x!tpu.dma_semaphore, #tpu.memory_space<semaphore_mem>> -> memref<1x1x!tpu.dma_semaphore, #tpu.memory_space<semaphore_mem>>
    %127 = tpu.memref_squeeze %126 : memref<1x1x!tpu.dma_semaphore, #tpu.memory_space<semaphore_mem>> -> memref<!tpu.dma_semaphore, #tpu.memory_space<semaphore_mem>>
    tpu.wait_dma2 semaphore(%127 : memref<!tpu.dma_semaphore, #tpu.memory_space<semaphore_mem>>) src(%124 : memref<1x128xf32, #tpu.memory_space<any>>) dst(%125 : memref<1x128xf32, #tpu.memory_space<vmem>>)
    %c1_i32_105 = arith.constant 1 : i32
    %c1_i32_106 = arith.constant 1 : i32
    %c0_i32_107 = arith.constant 0 : i32
    %128 = tpu.memref_slice %arg5[%23, %c0_i32_107] : memref<16x128xf32, #tpu.memory_space<any>> -> memref<1x128xf32, #tpu.memory_space<any>>
    %c1_i32_108 = arith.constant 1 : i32
    %c0_i32_109 = arith.constant 0 : i32
    %129 = tpu.memref_slice %arg8[%c1_i32_108, %c0_i32_109] : memref<8x128xf32, #tpu.memory_space<vmem>> -> memref<1x128xf32, #tpu.memory_space<vmem>>
    %130 = tpu.memref_slice %arg9[%c1_i32_105, %c1_i32_106] : memref<2x8x!tpu.dma_semaphore, #tpu.memory_space<semaphore_mem>> -> memref<1x1x!tpu.dma_semaphore, #tpu.memory_space<semaphore_mem>>
    %131 = tpu.memref_squeeze %130 : memref<1x1x!tpu.dma_semaphore, #tpu.memory_space<semaphore_mem>> -> memref<!tpu.dma_semaphore, #tpu.memory_space<semaphore_mem>>
    tpu.wait_dma2 semaphore(%131 : memref<!tpu.dma_semaphore, #tpu.memory_space<semaphore_mem>>) src(%128 : memref<1x128xf32, #tpu.memory_space<any>>) dst(%129 : memref<1x128xf32, #tpu.memory_space<vmem>>)
    %c0_i32_110 = arith.constant 0 : i32
    %c2_i32_111 = arith.constant 2 : i32
    %c0_i32_112 = arith.constant 0 : i32
    %132 = tpu.memref_slice %arg4[%34, %c0_i32_112] : memref<16x128xf32, #tpu.memory_space<any>> -> memref<1x128xf32, #tpu.memory_space<any>>
    %c2_i32_113 = arith.constant 2 : i32
    %c0_i32_114 = arith.constant 0 : i32
    %133 = tpu.memref_slice %arg7[%c2_i32_113, %c0_i32_114] : memref<8x128xf32, #tpu.memory_space<vmem>> -> memref<1x128xf32, #tpu.memory_space<vmem>>
    %134 = tpu.memref_slice %arg9[%c0_i32_110, %c2_i32_111] : memref<2x8x!tpu.dma_semaphore, #tpu.memory_space<semaphore_mem>> -> memref<1x1x!tpu.dma_semaphore, #tpu.memory_space<semaphore_mem>>
    %135 = tpu.memref_squeeze %134 : memref<1x1x!tpu.dma_semaphore, #tpu.memory_space<semaphore_mem>> -> memref<!tpu.dma_semaphore, #tpu.memory_space<semaphore_mem>>
    tpu.wait_dma2 semaphore(%135 : memref<!tpu.dma_semaphore, #tpu.memory_space<semaphore_mem>>) src(%132 : memref<1x128xf32, #tpu.memory_space<any>>) dst(%133 : memref<1x128xf32, #tpu.memory_space<vmem>>)
    %c1_i32_115 = arith.constant 1 : i32
    %c2_i32_116 = arith.constant 2 : i32
    %c0_i32_117 = arith.constant 0 : i32
    %136 = tpu.memref_slice %arg5[%37, %c0_i32_117] : memref<16x128xf32, #tpu.memory_space<any>> -> memref<1x128xf32, #tpu.memory_space<any>>
    %c2_i32_118 = arith.constant 2 : i32
    %c0_i32_119 = arith.constant 0 : i32
    %137 = tpu.memref_slice %arg8[%c2_i32_118, %c0_i32_119] : memref<8x128xf32, #tpu.memory_space<vmem>> -> memref<1x128xf32, #tpu.memory_space<vmem>>
    %138 = tpu.memref_slice %arg9[%c1_i32_115, %c2_i32_116] : memref<2x8x!tpu.dma_semaphore, #tpu.memory_space<semaphore_mem>> -> memref<1x1x!tpu.dma_semaphore, #tpu.memory_space<semaphore_mem>>
    %139 = tpu.memref_squeeze %138 : memref<1x1x!tpu.dma_semaphore, #tpu.memory_space<semaphore_mem>> -> memref<!tpu.dma_semaphore, #tpu.memory_space<semaphore_mem>>
    tpu.wait_dma2 semaphore(%139 : memref<!tpu.dma_semaphore, #tpu.memory_space<semaphore_mem>>) src(%136 : memref<1x128xf32, #tpu.memory_space<any>>) dst(%137 : memref<1x128xf32, #tpu.memory_space<vmem>>)
    %c0_i32_120 = arith.constant 0 : i32
    %c3_i32_121 = arith.constant 3 : i32
    %c0_i32_122 = arith.constant 0 : i32
    %140 = tpu.memref_slice %arg4[%48, %c0_i32_122] : memref<16x128xf32, #tpu.memory_space<any>> -> memref<1x128xf32, #tpu.memory_space<any>>
    %c3_i32_123 = arith.constant 3 : i32
    %c0_i32_124 = arith.constant 0 : i32
    %141 = tpu.memref_slice %arg7[%c3_i32_123, %c0_i32_124] : memref<8x128xf32, #tpu.memory_space<vmem>> -> memref<1x128xf32, #tpu.memory_space<vmem>>
    %142 = tpu.memref_slice %arg9[%c0_i32_120, %c3_i32_121] : memref<2x8x!tpu.dma_semaphore, #tpu.memory_space<semaphore_mem>> -> memref<1x1x!tpu.dma_semaphore, #tpu.memory_space<semaphore_mem>>
    %143 = tpu.memref_squeeze %142 : memref<1x1x!tpu.dma_semaphore, #tpu.memory_space<semaphore_mem>> -> memref<!tpu.dma_semaphore, #tpu.memory_space<semaphore_mem>>
    tpu.wait_dma2 semaphore(%143 : memref<!tpu.dma_semaphore, #tpu.memory_space<semaphore_mem>>) src(%140 : memref<1x128xf32, #tpu.memory_space<any>>) dst(%141 : memref<1x128xf32, #tpu.memory_space<vmem>>)
    %c1_i32_125 = arith.constant 1 : i32
    %c3_i32_126 = arith.constant 3 : i32
    %c0_i32_127 = arith.constant 0 : i32
    %144 = tpu.memref_slice %arg5[%51, %c0_i32_127] : memref<16x128xf32, #tpu.memory_space<any>> -> memref<1x128xf32, #tpu.memory_space<any>>
    %c3_i32_128 = arith.constant 3 : i32
    %c0_i32_129 = arith.constant 0 : i32
    %145 = tpu.memref_slice %arg8[%c3_i32_128, %c0_i32_129] : memref<8x128xf32, #tpu.memory_space<vmem>> -> memref<1x128xf32, #tpu.memory_space<vmem>>
    %146 = tpu.memref_slice %arg9[%c1_i32_125, %c3_i32_126] : memref<2x8x!tpu.dma_semaphore, #tpu.memory_space<semaphore_mem>> -> memref<1x1x!tpu.dma_semaphore, #tpu.memory_space<semaphore_mem>>
    %147 = tpu.memref_squeeze %146 : memref<1x1x!tpu.dma_semaphore, #tpu.memory_space<semaphore_mem>> -> memref<!tpu.dma_semaphore, #tpu.memory_space<semaphore_mem>>
    tpu.wait_dma2 semaphore(%147 : memref<!tpu.dma_semaphore, #tpu.memory_space<semaphore_mem>>) src(%144 : memref<1x128xf32, #tpu.memory_space<any>>) dst(%145 : memref<1x128xf32, #tpu.memory_space<vmem>>)
    %c0_i32_130 = arith.constant 0 : i32
    %c4_i32_131 = arith.constant 4 : i32
    %c0_i32_132 = arith.constant 0 : i32
    %148 = tpu.memref_slice %arg4[%62, %c0_i32_132] : memref<16x128xf32, #tpu.memory_space<any>> -> memref<1x128xf32, #tpu.memory_space<any>>
    %c4_i32_133 = arith.constant 4 : i32
    %c0_i32_134 = arith.constant 0 : i32
    %149 = tpu.memref_slice %arg7[%c4_i32_133, %c0_i32_134] : memref<8x128xf32, #tpu.memory_space<vmem>> -> memref<1x128xf32, #tpu.memory_space<vmem>>
    %150 = tpu.memref_slice %arg9[%c0_i32_130, %c4_i32_131] : memref<2x8x!tpu.dma_semaphore, #tpu.memory_space<semaphore_mem>> -> memref<1x1x!tpu.dma_semaphore, #tpu.memory_space<semaphore_mem>>
    %151 = tpu.memref_squeeze %150 : memref<1x1x!tpu.dma_semaphore, #tpu.memory_space<semaphore_mem>> -> memref<!tpu.dma_semaphore, #tpu.memory_space<semaphore_mem>>
    tpu.wait_dma2 semaphore(%151 : memref<!tpu.dma_semaphore, #tpu.memory_space<semaphore_mem>>) src(%148 : memref<1x128xf32, #tpu.memory_space<any>>) dst(%149 : memref<1x128xf32, #tpu.memory_space<vmem>>)
    %c1_i32_135 = arith.constant 1 : i32
    %c4_i32_136 = arith.constant 4 : i32
    %c0_i32_137 = arith.constant 0 : i32
    %152 = tpu.memref_slice %arg5[%65, %c0_i32_137] : memref<16x128xf32, #tpu.memory_space<any>> -> memref<1x128xf32, #tpu.memory_space<any>>
    %c4_i32_138 = arith.constant 4 : i32
    %c0_i32_139 = arith.constant 0 : i32
    %153 = tpu.memref_slice %arg8[%c4_i32_138, %c0_i32_139] : memref<8x128xf32, #tpu.memory_space<vmem>> -> memref<1x128xf32, #tpu.memory_space<vmem>>
    %154 = tpu.memref_slice %arg9[%c1_i32_135, %c4_i32_136] : memref<2x8x!tpu.dma_semaphore, #tpu.memory_space<semaphore_mem>> -> memref<1x1x!tpu.dma_semaphore, #tpu.memory_space<semaphore_mem>>
    %155 = tpu.memref_squeeze %154 : memref<1x1x!tpu.dma_semaphore, #tpu.memory_space<semaphore_mem>> -> memref<!tpu.dma_semaphore, #tpu.memory_space<semaphore_mem>>
    tpu.wait_dma2 semaphore(%155 : memref<!tpu.dma_semaphore, #tpu.memory_space<semaphore_mem>>) src(%152 : memref<1x128xf32, #tpu.memory_space<any>>) dst(%153 : memref<1x128xf32, #tpu.memory_space<vmem>>)
    %c0_i32_140 = arith.constant 0 : i32
    %c5_i32_141 = arith.constant 5 : i32
    %c0_i32_142 = arith.constant 0 : i32
    %156 = tpu.memref_slice %arg4[%76, %c0_i32_142] : memref<16x128xf32, #tpu.memory_space<any>> -> memref<1x128xf32, #tpu.memory_space<any>>
    %c5_i32_143 = arith.constant 5 : i32
    %c0_i32_144 = arith.constant 0 : i32
    %157 = tpu.memref_slice %arg7[%c5_i32_143, %c0_i32_144] : memref<8x128xf32, #tpu.memory_space<vmem>> -> memref<1x128xf32, #tpu.memory_space<vmem>>
    %158 = tpu.memref_slice %arg9[%c0_i32_140, %c5_i32_141] : memref<2x8x!tpu.dma_semaphore, #tpu.memory_space<semaphore_mem>> -> memref<1x1x!tpu.dma_semaphore, #tpu.memory_space<semaphore_mem>>
    %159 = tpu.memref_squeeze %158 : memref<1x1x!tpu.dma_semaphore, #tpu.memory_space<semaphore_mem>> -> memref<!tpu.dma_semaphore, #tpu.memory_space<semaphore_mem>>
    tpu.wait_dma2 semaphore(%159 : memref<!tpu.dma_semaphore, #tpu.memory_space<semaphore_mem>>) src(%156 : memref<1x128xf32, #tpu.memory_space<any>>) dst(%157 : memref<1x128xf32, #tpu.memory_space<vmem>>)
    %c1_i32_145 = arith.constant 1 : i32
    %c5_i32_146 = arith.constant 5 : i32
    %c0_i32_147 = arith.constant 0 : i32
    %160 = tpu.memref_slice %arg5[%79, %c0_i32_147] : memref<16x128xf32, #tpu.memory_space<any>> -> memref<1x128xf32, #tpu.memory_space<any>>
    %c5_i32_148 = arith.constant 5 : i32
    %c0_i32_149 = arith.constant 0 : i32
    %161 = tpu.memref_slice %arg8[%c5_i32_148, %c0_i32_149] : memref<8x128xf32, #tpu.memory_space<vmem>> -> memref<1x128xf32, #tpu.memory_space<vmem>>
    %162 = tpu.memref_slice %arg9[%c1_i32_145, %c5_i32_146] : memref<2x8x!tpu.dma_semaphore, #tpu.memory_space<semaphore_mem>> -> memref<1x1x!tpu.dma_semaphore, #tpu.memory_space<semaphore_mem>>
    %163 = tpu.memref_squeeze %162 : memref<1x1x!tpu.dma_semaphore, #tpu.memory_space<semaphore_mem>> -> memref<!tpu.dma_semaphore, #tpu.memory_space<semaphore_mem>>
    tpu.wait_dma2 semaphore(%163 : memref<!tpu.dma_semaphore, #tpu.memory_space<semaphore_mem>>) src(%160 : memref<1x128xf32, #tpu.memory_space<any>>) dst(%161 : memref<1x128xf32, #tpu.memory_space<vmem>>)
    %c0_i32_150 = arith.constant 0 : i32
    %c6_i32_151 = arith.constant 6 : i32
    %c0_i32_152 = arith.constant 0 : i32
    %164 = tpu.memref_slice %arg4[%90, %c0_i32_152] : memref<16x128xf32, #tpu.memory_space<any>> -> memref<1x128xf32, #tpu.memory_space<any>>
    %c6_i32_153 = arith.constant 6 : i32
    %c0_i32_154 = arith.constant 0 : i32
    %165 = tpu.memref_slice %arg7[%c6_i32_153, %c0_i32_154] : memref<8x128xf32, #tpu.memory_space<vmem>> -> memref<1x128xf32, #tpu.memory_space<vmem>>
    %166 = tpu.memref_slice %arg9[%c0_i32_150, %c6_i32_151] : memref<2x8x!tpu.dma_semaphore, #tpu.memory_space<semaphore_mem>> -> memref<1x1x!tpu.dma_semaphore, #tpu.memory_space<semaphore_mem>>
    %167 = tpu.memref_squeeze %166 : memref<1x1x!tpu.dma_semaphore, #tpu.memory_space<semaphore_mem>> -> memref<!tpu.dma_semaphore, #tpu.memory_space<semaphore_mem>>
    tpu.wait_dma2 semaphore(%167 : memref<!tpu.dma_semaphore, #tpu.memory_space<semaphore_mem>>) src(%164 : memref<1x128xf32, #tpu.memory_space<any>>) dst(%165 : memref<1x128xf32, #tpu.memory_space<vmem>>)
    %c1_i32_155 = arith.constant 1 : i32
    %c6_i32_156 = arith.constant 6 : i32
    %c0_i32_157 = arith.constant 0 : i32
    %168 = tpu.memref_slice %arg5[%93, %c0_i32_157] : memref<16x128xf32, #tpu.memory_space<any>> -> memref<1x128xf32, #tpu.memory_space<any>>
    %c6_i32_158 = arith.constant 6 : i32
    %c0_i32_159 = arith.constant 0 : i32
    %169 = tpu.memref_slice %arg8[%c6_i32_158, %c0_i32_159] : memref<8x128xf32, #tpu.memory_space<vmem>> -> memref<1x128xf32, #tpu.memory_space<vmem>>
    %170 = tpu.memref_slice %arg9[%c1_i32_155, %c6_i32_156] : memref<2x8x!tpu.dma_semaphore, #tpu.memory_space<semaphore_mem>> -> memref<1x1x!tpu.dma_semaphore, #tpu.memory_space<semaphore_mem>>
    %171 = tpu.memref_squeeze %170 : memref<1x1x!tpu.dma_semaphore, #tpu.memory_space<semaphore_mem>> -> memref<!tpu.dma_semaphore, #tpu.memory_space<semaphore_mem>>
    tpu.wait_dma2 semaphore(%171 : memref<!tpu.dma_semaphore, #tpu.memory_space<semaphore_mem>>) src(%168 : memref<1x128xf32, #tpu.memory_space<any>>) dst(%169 : memref<1x128xf32, #tpu.memory_space<vmem>>)
    %c0_i32_160 = arith.constant 0 : i32
    %c7_i32_161 = arith.constant 7 : i32
    %c0_i32_162 = arith.constant 0 : i32
    %172 = tpu.memref_slice %arg4[%104, %c0_i32_162] : memref<16x128xf32, #tpu.memory_space<any>> -> memref<1x128xf32, #tpu.memory_space<any>>
    %c7_i32_163 = arith.constant 7 : i32
    %c0_i32_164 = arith.constant 0 : i32
    %173 = tpu.memref_slice %arg7[%c7_i32_163, %c0_i32_164] : memref<8x128xf32, #tpu.memory_space<vmem>> -> memref<1x128xf32, #tpu.memory_space<vmem>>
    %174 = tpu.memref_slice %arg9[%c0_i32_160, %c7_i32_161] : memref<2x8x!tpu.dma_semaphore, #tpu.memory_space<semaphore_mem>> -> memref<1x1x!tpu.dma_semaphore, #tpu.memory_space<semaphore_mem>>
    %175 = tpu.memref_squeeze %174 : memref<1x1x!tpu.dma_semaphore, #tpu.memory_space<semaphore_mem>> -> memref<!tpu.dma_semaphore, #tpu.memory_space<semaphore_mem>>
    tpu.wait_dma2 semaphore(%175 : memref<!tpu.dma_semaphore, #tpu.memory_space<semaphore_mem>>) src(%172 : memref<1x128xf32, #tpu.memory_space<any>>) dst(%173 : memref<1x128xf32, #tpu.memory_space<vmem>>)
    %c1_i32_165 = arith.constant 1 : i32
    %c7_i32_166 = arith.constant 7 : i32
    %c0_i32_167 = arith.constant 0 : i32
    %176 = tpu.memref_slice %arg5[%107, %c0_i32_167] : memref<16x128xf32, #tpu.memory_space<any>> -> memref<1x128xf32, #tpu.memory_space<any>>
    %c7_i32_168 = arith.constant 7 : i32
    %c0_i32_169 = arith.constant 0 : i32
    %177 = tpu.memref_slice %arg8[%c7_i32_168, %c0_i32_169] : memref<8x128xf32, #tpu.memory_space<vmem>> -> memref<1x128xf32, #tpu.memory_space<vmem>>
    %178 = tpu.memref_slice %arg9[%c1_i32_165, %c7_i32_166] : memref<2x8x!tpu.dma_semaphore, #tpu.memory_space<semaphore_mem>> -> memref<1x1x!tpu.dma_semaphore, #tpu.memory_space<semaphore_mem>>
    %179 = tpu.memref_squeeze %178 : memref<1x1x!tpu.dma_semaphore, #tpu.memory_space<semaphore_mem>> -> memref<!tpu.dma_semaphore, #tpu.memory_space<semaphore_mem>>
    tpu.wait_dma2 semaphore(%179 : memref<!tpu.dma_semaphore, #tpu.memory_space<semaphore_mem>>) src(%176 : memref<1x128xf32, #tpu.memory_space<any>>) dst(%177 : memref<1x128xf32, #tpu.memory_space<vmem>>)
    %c0 = arith.constant 0 : index
    %c0_170 = arith.constant 0 : index
    %180 = vector.load %arg7[%c0, %c0_170] : memref<8x128xf32, #tpu.memory_space<vmem>>, vector<8x128xf32>
    %c0_171 = arith.constant 0 : index
    %c0_172 = arith.constant 0 : index
    %181 = vector.load %arg8[%c0_171, %c0_172] : memref<8x128xf32, #tpu.memory_space<vmem>>, vector<8x128xf32>
    %c0_173 = arith.constant 0 : index
    %c0_174 = arith.constant 0 : index
    %182 = vector.load %arg3[%c0_173, %c0_174] : memref<8x4xf32, #tpu.memory_space<vmem>>, vector<8x4xf32>
    %183 = vector.extract_strided_slice %182 {offsets = [0, 0], sizes = [8, 1], strides = [1, 1]} : vector<8x4xf32> to vector<8x1xf32>
    %184 = vector.extract_strided_slice %182 {offsets = [0, 1], sizes = [8, 1], strides = [1, 1]} : vector<8x4xf32> to vector<8x1xf32>
    %185 = vector.extract_strided_slice %182 {offsets = [0, 2], sizes = [8, 1], strides = [1, 1]} : vector<8x4xf32> to vector<8x1xf32>
    %186 = vector.extract_strided_slice %182 {offsets = [0, 3], sizes = [8, 1], strides = [1, 1]} : vector<8x4xf32> to vector<8x1xf32>
    %187 = arith.mulf %181, %180 : vector<8x128xf32>
    %cst = arith.constant dense<0.000000e+00> : vector<8xf32>
    %188 = vector.multi_reduction <add>, %187, %cst [1] : vector<8x128xf32> to vector<8xf32>
    %189 = vector.shape_cast %188 : vector<8xf32> to vector<8x1xf32>
    %190 = arith.addf %189, %183 : vector<8x1xf32>
    %191 = arith.addf %190, %184 : vector<8x1xf32>
    %192 = arith.subf %191, %185 : vector<8x1xf32>
    %193 = arith.mulf %186, %192 : vector<8x1xf32>
    %194 = arith.mulf %193, %192 : vector<8x1xf32>
    %195 = vector.shape_cast %194 : vector<8x1xf32> to vector<1x8x1xf32>
    %cst_175 = arith.constant dense<0.000000e+00> : vector<1xf32>
    %196 = vector.multi_reduction <add>, %195, %cst_175 [1, 2] : vector<1x8x1xf32> to vector<1xf32>
    %197 = vector.shape_cast %196 : vector<1xf32> to vector<1x1x1xf32>
    %198 = vector.extract %197[0, 0, 0] : f32 from vector<1x1x1xf32>
    %199 = vector.broadcast %198 : f32 to vector<1x1xf32>
    %c0_176 = arith.constant 0 : index
    %c0_177 = arith.constant 0 : index
    %200 = vector.load %arg6[%c0_176, %c0_177] : memref<1x1xf32, #tpu.memory_space<vmem>>, vector<1x1xf32>
    %201 = arith.addf %200, %199 : vector<1x1xf32>
    %c0_178 = arith.constant 0 : index
    %c0_179 = arith.constant 0 : index
    %202 = vector.load %arg6[%c0_178, %c0_179] : memref<1x1xf32, #tpu.memory_space<vmem>>, vector<1x1xf32>
    tpu.vector_store %arg6[%c0_178, %c0_179], %201 {strides = array<i32>} : memref<1x1xf32, #tpu.memory_space<vmem>>, vector<1x1xf32>,
    return
  }
  func.func @transform_0(%arg0: i32, %arg1: memref<16xi32, #tpu.memory_space<smem>>, %arg2: memref<16xi32, #tpu.memory_space<smem>>) -> (i32, i32) {
    %c0_i32 = arith.constant 0 : i32
    %c0_i32_0 = arith.constant 0 : i32
    return %arg0, %c0_i32 : i32, i32
  }
  func.func @transform_3(%arg0: i32, %arg1: memref<16xi32, #tpu.memory_space<smem>>, %arg2: memref<16xi32, #tpu.memory_space<smem>>) -> (i32, i32) {
    %c0_i32 = arith.constant 0 : i32
    %c0_i32_0 = arith.constant 0 : i32
    %c0_i32_1 = arith.constant 0 : i32
    return %c0_i32, %c0_i32_0 : i32, i32
  }
}

</mosaic_0001>

<bundles_post_ra>
// kernel: tpu_custom_call.1
= control target key start
LH: loop header
LB: loop body
LE: loop exit
PB: predicated region body
PF: predicated region fallthrough
CT: control target
= control target key end

     0   :  { %s1199_s24 = smov [#allocation6]   ;;  %s1200_s25 = smov [#allocation7]   ;;  %s1374_s0 = inlined_call_operand.vmem [shape: s32[16], index: 0, kind: input, shape index: {}]   ;;  %s1375_s2 = inlined_call_operand.vmem [shape: f32[16,4], index: 2, kind: input, shape index: {}]   ;;  %s1376_s3 = inlined_call_operand.vmem [shape: f32[16,128], index: 3, kind: input, shape index: {}]   ;;  %s1377_s4 = inlined_call_operand.hbm [shape: f32[16,128], index: 4, kind: input, shape index: {}]   ;;  %s1378_s5 = inlined_call_operand.hbm [shape: f32[1,1], index: 5, kind: output, shape index: {}]   ;;  %s1379_s1 = inlined_call_operand.vmem [shape: s32[16], index: 1, kind: input, shape index: {}]  }
   0x1   :  { %s11_s20 = sshll.u32 %s1374_s0, 4  ;;  %s16_s23 = sshll.u32 %s1379_s1, 4  ;;  %s12_s20 = int_to_ptr.vmem [resolvable:$true] %s11_s20  ;;  %s17_s23 = int_to_ptr.vmem [resolvable:$true] %s16_s23 }
   0x2   :  { %14 = dma.vmem_to_smem %s12_s20, 16, %s1199_s24, [#allocation5] }
   0x3   :  { %19 = dma.vmem_to_smem %s17_s23, 16, %s1200_s25, [#allocation5] }
   0x4   :  { %1157 = dma.done.wait [#allocation5], 32 }
   0x5   :  { %1158 = vsyncadd [#allocation5], 4294967264 }
   0x6   :  { %22 = sfence }
   0x7   :  { %23 = vsyncpa [#allocation9], 0  ;;  %s1251_s26 = smov 0  }
   0x8 LB: > { %s1257_s0 = sadd.s32 4294967295, %s1197_s26   ;;  %p853_p0 = scmp.ge.s32.totalorder %s1197_s26, 1  ;;  %s1197_s26 = sphi %s1251_s26, %s29_s26  }
   0x9   : > { %p99_p1 = scmp.lt.s32.totalorder %s1197_s26, 3 }
   0xb   : > { %p100_p2 = pnand %p853_p0, %p99_p1 }
   0xc   : > { %p113_p3 = scmp.lt.s32.totalorder (!%p100_p2), %s1257_s0, 1  ;;  %s1263_s1 = sshll.u32 (!%p100_p2), %s1257_s0, 3 }
   0xd   : > { %103 = sbr.rel (%p100_p2) target bundleno = 770 (0x302), region = 24  ;;  %p856_p4 = scmp.ne.s32.totalorder (!%p100_p2), %s1257_s0, 0 }
  0x12   : > { %s114_s27 = scalar_select %p113_p3, %s1257_s0, 1 }
  0x13   : > { %121 = sbr.rel (%p856_p4) target bundleno = 26 (0x1a), region = 28 }
  0x14   : > { %s854_s28 = sshll.u32 %s114_s27, 3 }
  0x15   : > { %s1269_s6 = scalar_lea.vmem %s1375_s2, %s854_s28 }
  0x18   : > { %vm122_vm0 = vcmask 0   ;;  %v1201_v0 = vmov 0.0  }
  0x19   : > { %123 = vst.msk [vmem:[#allocation8] sm:$0x1] %vm122_vm0, %v1201_v0 }
  0x1a PF: > { %s124_s7 = sld [smem:[#allocation6 + %s1263_s1]] }
  0x1b   : > { %s125_s8 = sld [smem:[#allocation7 + %s1263_s1]] }
  0x20   : > { %s126_s11 = scalar_lea.vmem %s1376_s3, %s124_s7 }
  0x21   : > { %v141_v1 = vld [vmem:[%s126_s11] sm:$0x1] }
  0x22   : > { %142 = vst [vmem:[#allocation2] sm:$0x1] %v141_v1 }
  0x23   : > { %160 = vsyncadd [#allocation4], 16  ;;  %s161_s14 = scalar_lea.hbm %s1377_s4, %s125_s8  ;;  %s1202_s16 = smov [#allocation3]  }
  0x24   : > { %s170_s15 = sshll.u32 %s161_s14, 4  ;;  %s172_s17 = sshll.u32 %s1202_s16, 4  ;;  %s171_s15 = int_to_ptr.hbm [resolvable:$true] %s170_s15  ;;  %s173_s17 = int_to_ptr.vmem [resolvable:$true] %s172_s17 }
  0x25   : > { %s933_s18 = sshra.s32 %s171_s15, 4  ;;  %s1283_s22 = scalar_lea.hbm %s1377_s4, 16  ;;  %s934_s18 = int_to_ptr.hbm [resolvable:$true] %s933_s18 }
  0x26   : > { %s935_s19 = scalar_lea.hbm %s934_s18, 1  ;;  %p938_p6 = scmp.lt.s32.totalorder %s934_s18, %s1377_s4 }
  0x27   : > { %p936_p5 = scmp.ne.s32.totalorder %s934_s18, %s935_s19  ;;  %p939_p7 = scmp.lt.s32.totalorder %s1283_s22, %s935_s19 }
  0x29   : > { %p940_p8 = por %p939_p7, %p938_p6 }
  0x2b   : > { %p941_p9 = pnand %p940_p8, %p936_p5 }
  0x2d   : > { %944 = shalt.err (!%p941_p9)  }
  0x2e   : > { %175 = dma.hbm_to_vmem [thread:$0]  %s171_s15, 16, %s173_s17, [#allocation4 + $0x8] }
  0x2f   : > { %s176_s25 = sadd.s32 1, %s1263_s1 }
  0x30   : > { %s177_s27 = sld [smem:[#allocation6 + %s176_s25]] }
  0x31   : > { %s178_s28 = sld [smem:[#allocation7 + %s176_s25]] }
  0x36   : > { %s179_s7 = scalar_lea.vmem %s1376_s3, %s177_s27 }
  0x37   : > { %v196_v2 = vld [vmem:[%s179_s7] sm:$0x1] }
  0x38   : > { %197 = vst [vmem:[#allocation2 + $0x1] sm:$0x1] %v196_v2 }
  0x39   : > { %215 = vsyncadd [#allocation4 + $0x1], 16  ;;  %s216_s10 = scalar_lea.hbm %s1377_s4, %s178_s28  ;;  %s1203_s12 = smov [#allocation3 + $0x1]  }
  0x3a   : > { %s226_s11 = sshll.u32 %s216_s10, 4  ;;  %s228_s13 = sshll.u32 %s1203_s12, 4  ;;  %s227_s11 = int_to_ptr.hbm [resolvable:$true] %s226_s11  ;;  %s229_s13 = int_to_ptr.vmem [resolvable:$true] %s228_s13 }
  0x3b   : > { %s957_s14 = sshra.s32 %s227_s11, 4  ;;  %s958_s14 = int_to_ptr.hbm [resolvable:$true] %s957_s14 }
  0x3c   : > { %s959_s15 = scalar_lea.hbm %s958_s14, 1  ;;  %p962_p11 = scmp.lt.s32.totalorder %s958_s14, %s1377_s4 }
  0x3d   : > { %p960_p10 = scmp.ne.s32.totalorder %s958_s14, %s959_s15  ;;  %p963_p12 = scmp.lt.s32.totalorder %s1283_s22, %s959_s15 }
  0x3f   : > { %p964_p13 = por %p963_p12, %p962_p11 }
  0x41   : > { %p965_p0 = pnand %p964_p13, %p960_p10 }
  0x43   : > { %968 = shalt.err (!%p965_p0)  }
  0x44   : > { %231 = dma.hbm_to_vmem [thread:$0]  %s227_s11, 16, %s229_s13, [#allocation4 + $0x9] }
  0x45   : > { %s232_s18 = sadd.s32 2, %s1263_s1 }
  0x46   : > { %s233_s19 = sld [smem:[#allocation6 + %s232_s18]] }
  0x47   : > { %s234_s20 = sld [smem:[#allocation7 + %s232_s18]] }
  0x4c   : > { %s235_s24 = scalar_lea.vmem %s1376_s3, %s233_s19 }
  0x4d   : > { %v252_v3 = vld [vmem:[%s235_s24] sm:$0x1] }
  0x4e   : > { %253 = vst [vmem:[#allocation2 + $0x2] sm:$0x1] %v252_v3 }
  0x4f   : > { %271 = vsyncadd [#allocation4 + $0x2], 16  ;;  %s272_s28 = scalar_lea.hbm %s1377_s4, %s234_s20  ;;  %s1204_s30 = smov [#allocation3 + $0x2]  }
  0x50   : > { %s282_s29 = sshll.u32 %s272_s28, 4  ;;  %s284_s7 = sshll.u32 %s1204_s30, 4  ;;  %s283_s29 = int_to_ptr.hbm [resolvable:$true] %s282_s29  ;;  %s285_s7 = int_to_ptr.vmem [resolvable:$true] %s284_s7 }
  0x51   : > { %s981_s8 = sshra.s32 %s283_s29, 4  ;;  %s982_s8 = int_to_ptr.hbm [resolvable:$true] %s981_s8 }
  0x52   : > { %s983_s9 = scalar_lea.hbm %s982_s8, 1  ;;  %p986_p2 = scmp.lt.s32.totalorder %s982_s8, %s1377_s4 }
  0x53   : > { %p984_p1 = scmp.ne.s32.totalorder %s982_s8, %s983_s9  ;;  %p987_p3 = scmp.lt.s32.totalorder %s1283_s22, %s983_s9 }
  0x55   : > { %p988_p4 = por %p987_p3, %p986_p2 }
  0x57   : > { %p989_p5 = pnand %p988_p4, %p984_p1 }
  0x59   : > { %992 = shalt.err (!%p989_p5)  }
  0x5a   : > { %287 = dma.hbm_to_vmem [thread:$0]  %s283_s29, 16, %s285_s7, [#allocation4 + $0xa] }
  0x5b   : > { %s288_s12 = sadd.s32 3, %s1263_s1 }
  0x5c   : > { %s289_s13 = sld [smem:[#allocation6 + %s288_s12]] }
  0x5d   : > { %s290_s14 = sld [smem:[#allocation7 + %s288_s12]] }
  0x62   : > { %s291_s17 = scalar_lea.vmem %s1376_s3, %s289_s13 }
  0x63   : > { %v308_v4 = vld [vmem:[%s291_s17] sm:$0x1] }
  0x64   : > { %309 = vst [vmem:[#allocation2 + $0x3] sm:$0x1] %v308_v4 }
  0x65   : > { %327 = vsyncadd [#allocation4 + $0x3], 16  ;;  %s328_s20 = scalar_lea.hbm %s1377_s4, %s290_s14  ;;  %s1205_s23 = smov [#allocation3 + $0x3]  }
  0x66   : > { %s338_s21 = sshll.u32 %s328_s20, 4  ;;  %s340_s24 = sshll.u32 %s1205_s23, 4  ;;  %s339_s21 = int_to_ptr.hbm [resolvable:$true] %s338_s21  ;;  %s341_s24 = int_to_ptr.vmem [resolvable:$true] %s340_s24 }
  0x67   : > { %s1005_s25 = sshra.s32 %s339_s21, 4  ;;  %s1006_s25 = int_to_ptr.hbm [resolvable:$true] %s1005_s25 }
  0x68   : > { %s1007_s27 = scalar_lea.hbm %s1006_s25, 1  ;;  %p1010_p7 = scmp.lt.s32.totalorder %s1006_s25, %s1377_s4 }
  0x69   : > { %p1008_p6 = scmp.ne.s32.totalorder %s1006_s25, %s1007_s27  ;;  %p1011_p8 = scmp.lt.s32.totalorder %s1283_s22, %s1007_s27 }
  0x6b   : > { %p1012_p9 = por %p1011_p8, %p1010_p7 }
  0x6d   : > { %p1013_p10 = pnand %p1012_p9, %p1008_p6 }
  0x6f   : > { %1016 = shalt.err (!%p1013_p10)  }
  0x70   : > { %343 = dma.hbm_to_vmem [thread:$0]  %s339_s21, 16, %s341_s24, [#allocation4 + $0xb] }
  0x71   : > { %s344_s30 = sadd.s32 4, %s1263_s1 }
  0x72   : > { %s345_s7 = sld [smem:[#allocation6 + %s344_s30]] }
  0x73   : > { %s346_s8 = sld [smem:[#allocation7 + %s344_s30]] }
  0x78   : > { %s347_s11 = scalar_lea.vmem %s1376_s3, %s345_s7 }
  0x79   : > { %v364_v5 = vld [vmem:[%s347_s11] sm:$0x1] }
  0x7a   : > { %365 = vst [vmem:[#allocation2 + $0x4] sm:$0x1] %v364_v5 }
  0x7b   : > { %383 = vsyncadd [#allocation4 + $0x4], 16  ;;  %s384_s14 = scalar_lea.hbm %s1377_s4, %s346_s8  ;;  %s1206_s16 = smov [#allocation3 + $0x4]  }
  0x7c   : > { %s394_s15 = sshll.u32 %s384_s14, 4  ;;  %s396_s17 = sshll.u32 %s1206_s16, 4  ;;  %s395_s15 = int_to_ptr.hbm [resolvable:$true] %s394_s15  ;;  %s397_s17 = int_to_ptr.vmem [resolvable:$true] %s396_s17 }
  0x7d   : > { %s1029_s18 = sshra.s32 %s395_s15, 4  ;;  %s1030_s18 = int_to_ptr.hbm [resolvable:$true] %s1029_s18 }
  0x7e   : > { %s1031_s19 = scalar_lea.hbm %s1030_s18, 1  ;;  %p1034_p12 = scmp.lt.s32.totalorder %s1030_s18, %s1377_s4 }
  0x7f   : > { %p1032_p11 = scmp.ne.s32.totalorder %s1030_s18, %s1031_s19  ;;  %p1035_p13 = scmp.lt.s32.totalorder %s1283_s22, %s1031_s19 }
  0x81   : > { %p1036_p0 = por %p1035_p13, %p1034_p12 }
  0x83   : > { %p1037_p1 = pnand %p1036_p0, %p1032_p11 }
  0x85   : > { %1040 = shalt.err (!%p1037_p1)  }
  0x86   : > { %399 = dma.hbm_to_vmem [thread:$0]  %s395_s15, 16, %s397_s17, [#allocation4 + $0xc] }
  0x87   : > { %s400_s23 = sadd.s32 5, %s1263_s1 }
  0x88   : > { %s401_s24 = sld [smem:[#allocation6 + %s400_s23]] }
  0x89   : > { %s402_s25 = sld [smem:[#allocation7 + %s400_s23]] }
  0x8e   : > { %s403_s29 = scalar_lea.vmem %s1376_s3, %s401_s24 }
  0x8f   : > { %v420_v6 = vld [vmem:[%s403_s29] sm:$0x1] }
  0x90   : > { %421 = vst [vmem:[#allocation2 + $0x5] sm:$0x1] %v420_v6 }
  0x91   : > { %439 = vsyncadd [#allocation4 + $0x5], 16  ;;  %s440_s8 = scalar_lea.hbm %s1377_s4, %s402_s25  ;;  %s1207_s10 = smov [#allocation3 + $0x5]  }
  0x92   : > { %s450_s9 = sshll.u32 %s440_s8, 4  ;;  %s452_s11 = sshll.u32 %s1207_s10, 4  ;;  %s451_s9 = int_to_ptr.hbm [resolvable:$true] %s450_s9  ;;  %s453_s11 = int_to_ptr.vmem [resolvable:$true] %s452_s11 }
  0x93   : > { %s1053_s12 = sshra.s32 %s451_s9, 4  ;;  %s1054_s12 = int_to_ptr.hbm [resolvable:$true] %s1053_s12 }
  0x94   : > { %s1055_s13 = scalar_lea.hbm %s1054_s12, 1  ;;  %p1058_p3 = scmp.lt.s32.totalorder %s1054_s12, %s1377_s4 }
  0x95   : > { %p1056_p2 = scmp.ne.s32.totalorder %s1054_s12, %s1055_s13  ;;  %p1059_p4 = scmp.lt.s32.totalorder %s1283_s22, %s1055_s13 }
  0x97   : > { %p1060_p5 = por %p1059_p4, %p1058_p3 }
  0x99   : > { %p1061_p6 = pnand %p1060_p5, %p1056_p2 }
  0x9b   : > { %1064 = shalt.err (!%p1061_p6)  }
  0x9c   : > { %455 = dma.hbm_to_vmem [thread:$0]  %s451_s9, 16, %s453_s11, [#allocation4 + $0xd] }
  0x9d   : > { %s456_s16 = sadd.s32 6, %s1263_s1 }
  0x9e   : > { %s457_s17 = sld [smem:[#allocation6 + %s456_s16]] }
  0x9f   : > { %s458_s18 = sld [smem:[#allocation7 + %s456_s16]] }
  0xa4   : > { %s459_s21 = scalar_lea.vmem %s1376_s3, %s457_s17 }
  0xa5   : > { %v476_v7 = vld [vmem:[%s459_s21] sm:$0x1] }
  0xa6   : > { %477 = vst [vmem:[#allocation2 + $0x6] sm:$0x1] %v476_v7 }
  0xa7   : > { %495 = vsyncadd [#allocation4 + $0x6], 16  ;;  %s496_s25 = scalar_lea.hbm %s1377_s4, %s458_s18  ;;  %s1208_s28 = smov [#allocation3 + $0x6]  }
  0xa8   : > { %s506_s27 = sshll.u32 %s496_s25, 4  ;;  %s508_s29 = sshll.u32 %s1208_s28, 4  ;;  %s507_s27 = int_to_ptr.hbm [resolvable:$true] %s506_s27  ;;  %s509_s29 = int_to_ptr.vmem [resolvable:$true] %s508_s29 }
  0xa9   : > { %s1077_s30 = sshra.s32 %s507_s27, 4  ;;  %s1078_s30 = int_to_ptr.hbm [resolvable:$true] %s1077_s30 }
  0xaa   : > { %s1079_s7 = scalar_lea.hbm %s1078_s30, 1  ;;  %p1082_p8 = scmp.lt.s32.totalorder %s1078_s30, %s1377_s4 }
  0xab   : > { %p1080_p7 = scmp.ne.s32.totalorder %s1078_s30, %s1079_s7  ;;  %p1083_p9 = scmp.lt.s32.totalorder %s1283_s22, %s1079_s7 }
  0xad   : > { %p1084_p10 = por %p1083_p9, %p1082_p8 }
  0xaf   : > { %p1085_p11 = pnand %p1084_p10, %p1080_p7 }
  0xb1   : > { %1088 = shalt.err (!%p1085_p11)  }
  0xb2   : > { %511 = dma.hbm_to_vmem [thread:$0]  %s507_s27, 16, %s509_s29, [#allocation4 + $0xe] }
  0xb3   : > { %s512_s10 = sadd.s32 7, %s1263_s1 }
  0xb4   : > { %s513_s11 = sld [smem:[#allocation6 + %s512_s10]] }
  0xb5   : > { %s514_s12 = sld [smem:[#allocation7 + %s512_s10]] }
  0xba   : > { %s515_s15 = scalar_lea.vmem %s1376_s3, %s513_s11 }
  0xbb   : > { %v532_v8 = vld [vmem:[%s515_s15] sm:$0x1] }
  0xbc   : > { %533 = vst [vmem:[#allocation2 + $0x7] sm:$0x1] %v532_v8 }
  0xbd   : > { %551 = vsyncadd [#allocation4 + $0x7], 16  ;;  %s552_s18 = scalar_lea.hbm %s1377_s4, %s514_s12  ;;  %s1209_s20 = smov [#allocation3 + $0x7]  }
  0xbe   : > { %s562_s19 = sshll.u32 %s552_s18, 4  ;;  %s564_s21 = sshll.u32 %s1209_s20, 4  ;;  %s563_s19 = int_to_ptr.hbm [resolvable:$true] %s562_s19  ;;  %s565_s21 = int_to_ptr.vmem [resolvable:$true] %s564_s21 }
  0xbf   : > { %s1101_s1 = sshra.s32 %s563_s19, 4  ;;  %s1102_s1 = int_to_ptr.hbm [resolvable:$true] %s1101_s1 }
  0xc0   : > { %s1103_s23 = scalar_lea.hbm %s1102_s1, 1  ;;  %p1106_p13 = scmp.lt.s32.totalorder %s1102_s1, %s1377_s4 }
  0xc1   : > { %p1104_p12 = scmp.ne.s32.totalorder %s1102_s1, %s1103_s23  ;;  %p1107_p0 = scmp.lt.s32.totalorder %s1283_s22, %s1103_s23 }
  0xc3   : > { %p1108_p1 = por %p1107_p0, %p1106_p13 }
  0xc5   : > { %p1109_p2 = pnand %p1108_p1, %p1104_p12 }
  0xc7   : > { %1112 = shalt.err (!%p1109_p2)  }
  0xc8   : > { %567 = dma.hbm_to_vmem [thread:$0]  %s563_s19, 16, %s565_s21, [#allocation4 + $0xf] }
  0xc9   : > { %1159 = dma.done.wait [#allocation4], 16 }
  0xca   : > { %1160 = vsyncadd [#allocation4], 4294967280 }
  0xcb   : > { %1161 = dma.done.wait [#allocation4 + $0x8], 16 }
  0xcc   : > { %1162 = vsyncadd [#allocation4 + $0x8], 4294967280 }
  0xcd   : > { %1163 = dma.done.wait [#allocation4 + $0x1], 16 }
  0xce   : > { %1164 = vsyncadd [#allocation4 + $0x1], 4294967280 }
  0xcf   : > { %1165 = dma.done.wait [#allocation4 + $0x9], 16 }
  0xd0   : > { %1166 = vsyncadd [#allocation4 + $0x9], 4294967280 }
  0xd1   : > { %1167 = dma.done.wait [#allocation4 + $0x2], 16 }
  0xd2   : > { %1168 = vsyncadd [#allocation4 + $0x2], 4294967280 }
  0xd3   : > { %1169 = dma.done.wait [#allocation4 + $0xa], 16 }
  0xd4   : > { %1170 = vsyncadd [#allocation4 + $0xa], 4294967280 }
  0xd5   : > { %1171 = dma.done.wait [#allocation4 + $0x3], 16 }
  0xd6   : > { %1172 = vsyncadd [#allocation4 + $0x3], 4294967280 }
  0xd7   : > { %1173 = dma.done.wait [#allocation4 + $0xb], 16 }
  0xd8   : > { %1174 = vsyncadd [#allocation4 + $0xb], 4294967280 }
  0xd9   : > { %1175 = dma.done.wait [#allocation4 + $0x4], 16 }
  0xda   : > { %1176 = vsyncadd [#allocation4 + $0x4], 4294967280 }
  0xdb   : > { %1177 = dma.done.wait [#allocation4 + $0xc], 16 }
  0xdc   : > { %1178 = vsyncadd [#allocation4 + $0xc], 4294967280 }
  0xdd   : > { %1179 = dma.done.wait [#allocation4 + $0x5], 16 }
  0xde   : > { %1180 = vsyncadd [#allocation4 + $0x5], 4294967280 }
  0xdf   : > { %1181 = dma.done.wait [#allocation4 + $0xd], 16 }
  0xe0   : > { %1182 = vsyncadd [#allocation4 + $0xd], 4294967280 }
  0xe1   : > { %1183 = dma.done.wait [#allocation4 + $0x6], 16 }
  0xe2   : > { %1184 = vsyncadd [#allocation4 + $0x6], 4294967280 }
  0xe3   : > { %1185 = dma.done.wait [#allocation4 + $0xe], 16 }
  0xe4   : > { %1186 = vsyncadd [#allocation4 + $0xe], 4294967280 }
  0xe5   : > { %1187 = dma.done.wait [#allocation4 + $0x7], 16 }
  0xe6   : > { %1188 = vsyncadd [#allocation4 + $0x7], 4294967280 }
  0xe7   : > { %1189 = dma.done.wait [#allocation4 + $0xf], 16 }
  0xe8   : > { %1190 = vsyncadd [#allocation4 + $0xf], 4294967280  ;;  %v601_v9 = vld [vmem:[#allocation2] sm:$0xff]  ;;  %v602_v10 = vld [vmem:[#allocation3] sm:$0xff]  ;;  %s1210_s22 = smov 126   ;;  %s1211_s27 = smov 127  }
  0xe9   : > { %v603_v11 = vld [vmem:[%s1269_s6] sm:$0xff]  ;;  %v604_v12 = vmul.f32 %v602_v10, %v601_v9  ;;  %s1212_s28 = smov 3   ;;  %s1213_s29 = smov 125   ;;  %vm627_vm1 = vcmask 7168   ;;  %v639_v31 = vld [vmem:[#allocation8] sm:$0x1] }
  0xea   : > { %613 = vrot.lane.b32.xlu1 %v603_v11, %s1210_s22  ;;  %s1214_s6 = smov [#allocation8]   ;;  %s651_s9 = sshll.u32 %s1378_s5, 4  ;;  %vm641_vm2 = vcmask 0   ;;  %s652_s9 = int_to_ptr.hbm [resolvable:$true] %s651_s9 }
  0xeb   : > { %605 = vadd.xlane.f32.xlu0 %v604_v12  ;;  %s649_s30 = sshll.u32 %s1214_s6, 4  ;;  %p883_p3 = scmp.eq.s32.totalorder %s1257_s0, 1  ;;  %s650_s30 = int_to_ptr.vmem [resolvable:$true] %s649_s30 }
  0xff   : > { %609 = vrot.lane.b32.xlu0 %v603_v11, %s1211_s27 }
 0x15c   : > { %v614_v16 = vpop.permute.xlu1 %613 }
 0x15e   : > { %v606_v13 = vpop.xlane.xlu0 %605 }
 0x15f   : > { %v607_v14 = vadd.f32 %v606_v13, %v603_v11 }
 0x171   : > { %v610_v15 = vpop.permute.xlu0 %609 }
 0x172   : > { %v612_v17 = vadd.f32 %v610_v15, %v607_v14 }
 0x174   : > { %v616_v18 = vsub.f32 %v612_v17, %v614_v16 }
 0x176   : > { %618 = vrot.lane.b32.xlu1 %v616_v18, %s1212_s28 }
 0x1e8   : > { %v619_v19 = vpop.permute.xlu1 %618 }
 0x1e9   : > { %v621_v20 = vmul.f32 %v619_v19, %v603_v11 }
 0x1eb   : > { %v622_v21 = vmul.f32 %v621_v20, %v619_v19 }
 0x1ed   : > { %624 = vrot.lane.b32.xlu2 %v622_v21, %s1213_s29 }
 0x247   : > { %v625_v22 = vpop.permute.xlu2 %624 }
 0x248   : > { %v628_v23 = vsel %vm627_vm1, %v625_v22, 0.0 }
 0x249   : > { %629 = vadd.xlane.f32.xlu2 %v628_v23 }
 0x2bc   : > { %v630_v24 = vpop.xlane.xlu2 %629 }
 0x2bd   : > { %v631_v25 = vrot.slane %v630_v24, 4 }
 0x2bf   : > { %v632_v26 = vadd.f32 %v631_v25, %v630_v24 }
 0x2c1   : > { %v633_v27 = vrot.slane %v632_v26, 2 }
 0x2c3   : > { %v634_v28 = vadd.f32 %v633_v27, %v632_v26 }
 0x2c5   : > { %v635_v29 = vrot.slane %v634_v28, 1 }
 0x2c7   : > { %v636_v30 = vadd.f32 %v635_v29, %v634_v28 }
 0x2c9   : > { %877 = vpush %v636_v30 }
 0x2fa   : > { %s878_s10 = spop %877 }
 0x2fb   : > { %v638_v32 = vstv %s878_s10 }
 0x2fc   : > { %v640_v33 = vadd.f32 %v639_v31, %v638_v32 }
 0x2fe   : > { %642 = vst.msk [vmem:[#allocation8] sm:$0x1] %vm641_vm2, %v640_v33 }
 0x2ff   : > { %880 = dma.vmem_to_hbm [thread:$0]  (%p883_p3), %s650_s30, 16, %s652_s9, [#allocation9]  }
 0x300   : > { %1192 = dma.done.wait (%p883_p3), [#allocation9], 16  }
 0x301   : > { %1194 = vsyncadd (%p883_p3), [#allocation9], 4294967280 }
 0x302 PF: > { %s29_s26 = sadd.s32 1, %s1197_s26  }
 0x303   : > { %p26_p4 = scmp.ge.s32.totalorder %s29_s26, 4  }
 0x305   :  { %28 = sbr.rel (!%p26_p4) target bundleno = 8 (0x8), region = 419 }
 0x30a   :  { %665 = vsyncpa [#allocation9], 1 }
 0x30b   :  { %667 = vsyncpa [#allocation9 + $0x1], 1 }
 0x30c   :  { %668 = vsyncmov [#allocation4] }
 0x30f   :  { %s669_s11 = vpop.sfrf %668 }
 0x310   :  { %p861_p5 = scmp.ne.s32.totalorder %s669_s11, 0 }
 0x312   :  { %673 = shalt.err (%p861_p5)  }
 0x313   :  { %675 = vsyncmov [#allocation4 + $0x1] }
 0x316   :  { %s676_s0 = vpop.sfrf %675 }
 0x317   :  { %p862_p6 = scmp.ne.s32.totalorder %s676_s0, 0 }
 0x319   :  { %680 = shalt.err (%p862_p6)  }
 0x31a   :  { %682 = vsyncmov [#allocation4 + $0x2] }
 0x31d   :  { %s683_s12 = vpop.sfrf %682 }
 0x31e   :  { %p863_p7 = scmp.ne.s32.totalorder %s683_s12, 0 }
 0x320   :  { %687 = shalt.err (%p863_p7)  }
 0x321   :  { %689 = vsyncmov [#allocation4 + $0x3] }
 0x324   :  { %s690_s13 = vpop.sfrf %689 }
 0x325   :  { %p864_p8 = scmp.ne.s32.totalorder %s690_s13, 0 }
 0x327   :  { %694 = shalt.err (%p864_p8)  }
 0x328   :  { %696 = vsyncmov [#allocation4 + $0x4] }
 0x32b   :  { %s697_s26 = vpop.sfrf %696 }
 0x32c   :  { %p865_p9 = scmp.ne.s32.totalorder %s697_s26, 0 }
 0x32e   :  { %701 = shalt.err (%p865_p9)  }
 0x32f   :  { %703 = vsyncmov [#allocation4 + $0x5] }
 0x332   :  { %s704_s2 = vpop.sfrf %703 }
 0x333   :  { %p866_p10 = scmp.ne.s32.totalorder %s704_s2, 0 }
 0x335   :  { %708 = shalt.err (%p866_p10)  }
 0x336   :  { %710 = vsyncmov [#allocation4 + $0x6] }
 0x339   :  { %s711_s3 = vpop.sfrf %710 }
 0x33a   :  { %p867_p11 = scmp.ne.s32.totalorder %s711_s3, 0 }
 0x33c   :  { %715 = shalt.err (%p867_p11)  }
 0x33d   :  { %717 = vsyncmov [#allocation4 + $0x7] }
 0x340   :  { %s718_s4 = vpop.sfrf %717 }
 0x341   :  { %p868_p12 = scmp.ne.s32.totalorder %s718_s4, 0 }
 0x343   :  { %722 = shalt.err (%p868_p12)  }
 0x344   :  { %724 = vsyncmov [#allocation4 + $0x8] }
 0x347   :  { %s725_s5 = vpop.sfrf %724 }
 0x348   :  { %p869_p13 = scmp.ne.s32.totalorder %s725_s5, 0 }
 0x34a   :  { %729 = shalt.err (%p869_p13)  }
 0x34b   :  { %731 = vsyncmov [#allocation4 + $0x9] }
 0x34e   :  { %s732_s14 = vpop.sfrf %731 }
 0x34f   :  { %p870_p0 = scmp.ne.s32.totalorder %s732_s14, 0 }
 0x351   :  { %736 = shalt.err (%p870_p0)  }
 0x352   :  { %738 = vsyncmov [#allocation4 + $0xa] }
 0x355   :  { %s739_s15 = vpop.sfrf %738 }
 0x356   :  { %p871_p1 = scmp.ne.s32.totalorder %s739_s15, 0 }
 0x358   :  { %743 = shalt.err (%p871_p1)  }
 0x359   :  { %745 = vsyncmov [#allocation4 + $0xb] }
 0x35c   :  { %s746_s16 = vpop.sfrf %745 }
 0x35d   :  { %p872_p2 = scmp.ne.s32.totalorder %s746_s16, 0 }
 0x35f   :  { %750 = shalt.err (%p872_p2)  }
 0x360   :  { %752 = vsyncmov [#allocation4 + $0xc] }
 0x363   :  { %s753_s17 = vpop.sfrf %752 }
 0x364   :  { %p873_p3 = scmp.ne.s32.totalorder %s753_s17, 0 }
 0x366   :  { %757 = shalt.err (%p873_p3)  }
 0x367   :  { %759 = vsyncmov [#allocation4 + $0xd] }
 0x36a   :  { %s760_s18 = vpop.sfrf %759 }
 0x36b   :  { %p874_p4 = scmp.ne.s32.totalorder %s760_s18, 0 }
 0x36d   :  { %764 = shalt.err (%p874_p4)  }
 0x36e   :  { %766 = vsyncmov [#allocation4 + $0xe] }
 0x371   :  { %s767_s19 = vpop.sfrf %766 }
 0x372   :  { %p875_p5 = scmp.ne.s32.totalorder %s767_s19, 0 }
 0x374   :  { %771 = shalt.err (%p875_p5)  }
 0x375   :  { %773 = vsyncmov [#allocation4 + $0xf] }
 0x378   :  { %s774_s20 = vpop.sfrf %773 }
 0x379   :  { %p876_p6 = scmp.ne.s32.totalorder %s774_s20, 0 }
 0x37b   :  { %778 = shalt.err (%p876_p6)  }

</bundles_post_ra>
